<compile_context>
chip_gen: v5e
topology: v5e:2x2
jax: 0.10.0
libtpu: 0.0.40
codegen_flags: <defaults>
</compile_context>

<pallas_src>
import functools

import jax
import jax.numpy as jnp
from jax import lax
from jax.experimental import pallas as pl
from jax.experimental.pallas import tpu as pltpu


# ---------------------------------------------------------------------------
# Fused kernel: one (chunk, batch, spatial-tile) step of the whole pipeline.
# Layout inside the kernel: features on sublanes, H*W on lanes.
# ---------------------------------------------------------------------------
def _gavig_fused_kernel(x_ref,
                        uw1_ref, ub1_ref, uw2_ref, ub2_ref, uw3_ref, ub3_ref,
                        sw_ref, sb_ref, fw1_ref, fb1_ref, fw2_ref, fb2_ref,
                        gaze_ref, pooled_ref,
                        *, inv_hw, hw, tile_hw, tiles_per_chunk, needs_mask):
    x = x_ref[0].astype(jnp.float32)                          # (C, T)

    def small_k_fma(w_ref, b_ref, rhs):
        # (out, K) @ (K, T) with tiny K (= C): unrolled VPU broadcast-FMAs.
        # Keeps the MXU-push slot free for the (hidden, hidden) dots below.
        w = w_ref[...]
        acc = w[:, 0:1] * rhs[0:1, :] + b_ref[...]
        for k in range(1, w.shape[1]):
            acc = acc + w[:, k:k + 1] * rhs[k:k + 1, :]
        return acc

    def mxu(w_ref, b_ref, rhs):
        return jnp.dot(w_ref[...], rhs,
                       preferred_element_type=jnp.float32) + b_ref[...]

    # --- ViGUNet surrogate -> gaze map (same shape as x) -------------------
    f1 = jax.nn.gelu(small_k_fma(uw1_ref, ub1_ref, x))        # K = C  -> VPU
    f2 = jax.nn.gelu(mxu(uw2_ref, ub2_ref, f1))               # K = 32 -> MXU
    z = mxu(uw3_ref, ub3_ref, f2)                             # K = 32 -> MXU
    # sigmoid via exp + approximate reciprocal (both on the EUP slot).
    gaze = pl.reciprocal(1.0 + jnp.exp(-z), approx=True)      # (C, T)
    gaze_ref[...] = gaze[None].astype(gaze_ref.dtype)         # lane-dense vst

    # --- ViG_Gaze surrogate: gaze-gated stem + residual FFN ----------------
    # (consumes torch.stack([x, gaze]) without ever materializing it)
    feat = jax.nn.gelu(small_k_fma(sw_ref, sb_ref, x * gaze)) # K = C  -> VPU
    u = jax.nn.gelu(mxu(fw1_ref, fb1_ref, feat))
    ffn = feat + mxu(fw2_ref, fb2_ref, u)                     # (hidden, T)

    # --- global average pool over the TRUE (unpadded) spatial extent -------
    if needs_mask:  # static flag: mask code only emitted when hw was padded
        col0 = (pl.program_id(0) * tiles_per_chunk + pl.program_id(2)) * tile_hw
        lane_idx = lax.broadcasted_iota(jnp.int32, (1, tile_hw), 1)
        ffn = jnp.where(lane_idx + col0 < hw, ffn, 0.0)
    partial = jnp.sum(ffn, axis=1, keepdims=True) * inv_hw    # (hidden, 1)

    @pl.when(pl.program_id(2) == 0)
    def _():
        pooled_ref[...] = jnp.zeros_like(pooled_ref)
    pooled_ref[...] += partial.reshape(pooled_ref.shape)


# ---------------------------------------------------------------------------
# Tiling helpers
# ---------------------------------------------------------------------------
def _round_up(x, m):
    return ((x + m - 1) // m) * m


def _vmem_safe_cols(hidden, c, budget_bytes=28 * 1024 * 1024):
    # ~6 live (hidden, tile) f32 intermediates + double-buffered x/gaze blocks;
    # conservative so the same tiling stays safe on v7x's 64 MiB VMEM.
    bytes_per_col = 4 * (6 * hidden + 8 * c)
    return max(256, (budget_bytes // bytes_per_col) // 256 * 256)


def _pick_tile(hw, target):
    """Lane-aligned spatial tile.  Returns (tile_hw, padded_hw)."""
    lane = 256 if hw >= 256 else 128
    t = (min(hw, target) // lane) * lane
    while t >= lane:                       # prefer a divisor: no padding copy
        if hw % t == 0:
            return t, hw
        t -= lane
    tile = min(_round_up(hw, lane), _round_up(target, lane))
    return tile, _round_up(hw, tile)       # pad + mask path


# ---------------------------------------------------------------------------
# Wrapper
# ---------------------------------------------------------------------------
_WEIGHT_NAMES = ("unet_w1", "unet_b1", "unet_w2", "unet_b2",
                 "unet_w3", "unet_b3", "stem_w", "stem_b",
                 "ffn_w1", "ffn_b1", "ffn_w2", "ffn_b2")


def gavig_fused_call(x3, params, *, tile_hw=None, n_chunks=None):
    """x3: (B, C, H*W).  Returns (gaze (B, C, H*W), pooled (B, hidden))."""
    b, c, hw = x3.shape
    hidden = params["stem_w"].shape[1]

    target = min(4096, _vmem_safe_cols(hidden, c))
    if tile_hw is None:
        tile_hw, hw_pad = _pick_tile(hw, target)
    else:
        assert tile_hw % 128 == 0
        hw_pad = _round_up(hw, tile_hw)
    n_tiles = hw_pad // tile_hw

    if n_chunks is None:
        # v7x has 2 TensorCores: if the batch alone cannot feed both, split
        # the spatial axis into parallel chunks with PRIVATE pooled slots.
        n_chunks = 2 if (b < 2 and n_tiles % 2 == 0) else 1
    assert n_tiles % n_chunks == 0
    tiles_per_chunk = n_tiles // n_chunks

    if hw_pad != hw:
        x3 = jnp.pad(x3, ((0, 0), (0, 0), (0, hw_pad - hw)))

    # Pre-transpose weights to (out, in) and biases to columns so every
    # contraction is (out, K) @ (K, tile_hw) with H*W staying on lanes.
    weights = [params[n].T if "_w" in n else params[n].reshape(-1, 1)
               for n in _WEIGHT_NAMES]

    def const_spec(a):
        nd = a.ndim
        return pl.BlockSpec(a.shape, lambda ch, i, j, nd=nd: (0,) * nd)

    spatial_spec = pl.BlockSpec(
        (1, c, tile_hw),
        lambda ch, i, j, t=tiles_per_chunk: (i, 0, ch * t + j))

    kernel = functools.partial(
        _gavig_fused_kernel, inv_hw=1.0 / hw, hw=hw, tile_hw=tile_hw,
        tiles_per_chunk=tiles_per_chunk, needs_mask=(hw_pad != hw))

    gaze3, pooled4 = pl.pallas_call(
        kernel,
        out_shape=(jax.ShapeDtypeStruct((b, c, hw_pad), x3.dtype),
                   jax.ShapeDtypeStruct((n_chunks, b, hidden, 1), jnp.float32)),
        grid=(n_chunks, b, tiles_per_chunk),
        in_specs=[spatial_spec] + [const_spec(a) for a in weights],
        out_specs=(spatial_spec,
                   pl.BlockSpec((1, 1, hidden, 1),
                                lambda ch, i, j: (ch, i, 0, 0))),
        compiler_params=pltpu.CompilerParams(
            dimension_semantics=("parallel", "parallel", "arbitrary"),
            vmem_limit_bytes=40 * 1024 * 1024),
    )(x3, *weights)

    if hw_pad != hw:
        gaze3 = gaze3[:, :, :hw]
    pooled = jnp.sum(pooled4[:, :, :, 0], axis=0)             # (B, hidden)
    return gaze3, pooled


def prediction_head(pooled, params):
    # Tiny (B,hidden)@(hidden,head)@(head,3) matmuls: plain XLA; a dedicated
    # pallas_call (or fusing into the last grid step) saves only a few us and
    # conflicts with the chunk-parallel pooled partials.
    hdr = jax.nn.gelu(pooled @ params["head_w1"] + params["head_b1"])
    return hdr @ params["head_w2"] + params["head_b2"]


def gavig_forward(x_nchw, params, *, tile_hw=None, n_chunks=None):
    b, c, h, w = x_nchw.shape
    gaze3, pooled = gavig_fused_call(x_nchw.reshape(b, c, h * w), params,
                                     tile_hw=tile_hw, n_chunks=n_chunks)
    pred = prediction_head(pooled, params)                    # (B, 3)
    return pred, gaze3.reshape(b, c, h, w)                    # self.gaze (NCHW)


# ---------------------------------------------------------------------------
# Parameters
# ---------------------------------------------------------------------------
def _kaiming(key, shape):
    fan_in = shape[0]
    return jax.random.normal(key, shape, jnp.float32) * jnp.sqrt(2.0 / fan_in)


def init_params(key, in_ch, hidden, head_dim, num_out=3):
    ks = jax.random.split(key, 8)
    z = lambda n: jnp.zeros((1, n), jnp.float32)
    return {
        # ViGUNet surrogate (encoder -> mid -> decoder-to-gaze)
        "unet_w1": _kaiming(ks[0], (in_ch, hidden)), "unet_b1": z(hidden),
        "unet_w2": _kaiming(ks[1], (hidden, hidden)), "unet_b2": z(hidden),
        "unet_w3": _kaiming(ks[2], (hidden, in_ch)), "unet_b3": z(in_ch),
        # ViG_Gaze surrogate (gaze-gated stem + residual FFN)
        "stem_w": _kaiming(ks[3], (in_ch, hidden)), "stem_b": z(hidden),
        "ffn_w1": _kaiming(ks[4], (hidden, hidden)), "ffn_b1": z(hidden),
        "ffn_w2": _kaiming(ks[5], (hidden, hidden)), "ffn_b2": z(hidden),
        # prediction head; final layer is the replaced Conv2d(in, 3, 1x1)
        # with kaiming_normal_ weights and zero bias, as in GAViG.__init__.
        "head_w1": _kaiming(ks[6], (hidden, head_dim)), "head_b1": z(head_dim),
        "head_w2": _kaiming(ks[7], (head_dim, num_out)), "head_b2": z(num_out),
    }


# ---------------------------------------------------------------------------
# Pure-JAX reference of the same surrogate forward (sanity check)
# ---------------------------------------------------------------------------
def gavig_reference(x_nchw, params):
    x = jnp.transpose(x_nchw, (0, 2, 3, 1)).astype(jnp.float32)
    b, h, w, c = x.shape
    rows = x.reshape(b * h * w, c)
    f1 = jax.nn.gelu(rows @ params["unet_w1"] + params["unet_b1"])
    f2 = jax.nn.gelu(f1 @ params["unet_w2"] + params["unet_b2"])
    gaze = jax.nn.sigmoid(f2 @ params["unet_w3"] + params["unet_b3"])
    feat = jax.nn.gelu((rows * gaze) @ params["stem_w"] + params["stem_b"])
    ffn = feat + jax.nn.gelu(feat @ params["ffn_w1"]
                             + params["ffn_b1"]) @ params["ffn_w2"] + params["ffn_b2"]
    pooled = jnp.mean(ffn.reshape(b, h * w, -1), axis=1)
    pred = prediction_head(pooled, params)
    gaze_nchw = jnp.transpose(gaze.reshape(b, h, w, c), (0, 3, 1, 2))
    return pred, gaze_nchw


# ---------------------------------------------------------------------------
if __name__ == "__main__":
    C, HIDDEN, HEAD = 4, 32, 64
    key = jax.random.PRNGKey(0)
    kp, ka, kb, kc = jax.random.split(key, 4)
    params = init_params(kp, C, HIDDEN, HEAD, num_out=3)

    fwd = jax.jit(gavig_forward, static_argnames=("tile_hw", "n_chunks"))

    # 1) B=2, 16x16: aligned 256-col tile, megacore split over the batch axis.
    x_a = jax.random.normal(ka, (2, C, 16, 16), jnp.float32)
    pred_a, gaze_a = fwd(x_a, params)
    jax.block_until_ready((pred_a, gaze_a))
    pr_a, gr_a = gavig_reference(x_a, params)
    assert pred_a.shape == (2, 3) and gaze_a.shape == x_a.shape
    assert jnp.allclose(pred_a, pr_a, atol=2e-2, rtol=2e-2)
    assert jnp.allclose(gaze_a, gr_a, atol=2e-2, rtol=2e-2)

    # 2) B=1, 32x32 with an explicit 512-col tile: exercises the parallel
    #    spatial-chunk split (2 chunks, private pooled slots) for v7x.
    x_b = jax.random.normal(kb, (1, C, 32, 32), jnp.float32)
    pred_b, gaze_b = fwd(x_b, params, tile_hw=512)
    jax.block_until_ready((pred_b, gaze_b))
    pr_b, gr_b = gavig_reference(x_b, params)
    assert jnp.allclose(pred_b, pr_b, atol=2e-2, rtol=2e-2)
    assert jnp.allclose(gaze_b, gr_b, atol=2e-2, rtol=2e-2)

    # 3) B=1, 20x20 (hw=400): exercises the pad-to-512 + tail-mask path.
    x_c = jax.random.normal(kc, (1, C, 20, 20), jnp.float32)
    pred_c, gaze_c = fwd(x_c, params)
    jax.block_until_ready((pred_c, gaze_c))
    pr_c, gr_c = gavig_reference(x_c, params)
    assert jnp.allclose(pred_c, pr_c, atol=2e-2, rtol=2e-2)
    assert jnp.allclose(gaze_c, gr_c, atol=2e-2, rtol=2e-2)

    # 4) bf16 x / gaze I/O (halves the dominant HBM traffic; f32 accumulation).
    pred_d, gaze_d = fwd(x_a.astype(jnp.bfloat16), params)
    jax.block_until_ready((pred_d, gaze_d))
    assert gaze_d.dtype == jnp.bfloat16
    assert bool(jnp.all(jnp.isfinite(pred_d)))

    print("KERNEL_OK")
</pallas_src>

<mosaic_0001>
module attributes {stable_mosaic.version = 11 : i64} {
  func.func @_gavig_fused_kernel(%arg0: i32, %arg1: i32, %arg2: i32, %arg3: memref<1x4x256xf32, #tpu.memory_space<vmem>>, %arg4: memref<32x4xf32, #tpu.memory_space<vmem>>, %arg5: memref<32x1xf32, #tpu.memory_space<vmem>>, %arg6: memref<32x32xf32, #tpu.memory_space<vmem>>, %arg7: memref<32x1xf32, #tpu.memory_space<vmem>>, %arg8: memref<4x32xf32, #tpu.memory_space<vmem>>, %arg9: memref<4x1xf32, #tpu.memory_space<vmem>>, %arg10: memref<32x4xf32, #tpu.memory_space<vmem>>, %arg11: memref<32x1xf32, #tpu.memory_space<vmem>>, %arg12: memref<32x32xf32, #tpu.memory_space<vmem>>, %arg13: memref<32x1xf32, #tpu.memory_space<vmem>>, %arg14: memref<32x32xf32, #tpu.memory_space<vmem>>, %arg15: memref<32x1xf32, #tpu.memory_space<vmem>>, %arg16: memref<1x4x256xf32, #tpu.memory_space<vmem>>, %arg17: memref<1x1x32x1xf32, #tpu.memory_space<vmem>>) attributes {dimension_semantics = [#tpu.dimension_semantics<parallel>, #tpu.dimension_semantics<parallel>, #tpu.dimension_semantics<arbitrary>], iteration_bounds = array<i64: 1, 2, 1>, scalar_prefetch = 0 : i64, scratch_operands = 0 : i64, tpu.core_type = #tpu.core_type<tc>, window_params = [{transform_indices = @transform_0, window_bounds = array<i64: 1, 4, 256>}, {pipeline_mode = #tpu.pipeline_mode<synchronous>, transform_indices = @transform_1, window_bounds = array<i64: 32, 4>}, {pipeline_mode = #tpu.pipeline_mode<synchronous>, transform_indices = @transform_2, window_bounds = array<i64: 32, 1>}, {pipeline_mode = #tpu.pipeline_mode<synchronous>, transform_indices = @transform_3, window_bounds = array<i64: 32, 32>}, {pipeline_mode = #tpu.pipeline_mode<synchronous>, transform_indices = @transform_4, window_bounds = array<i64: 32, 1>}, {pipeline_mode = #tpu.pipeline_mode<synchronous>, transform_indices = @transform_5, window_bounds = array<i64: 4, 32>}, {pipeline_mode = #tpu.pipeline_mode<synchronous>, transform_indices = @transform_6, window_bounds = array<i64: 4, 1>}, {pipeline_mode = #tpu.pipeline_mode<synchronous>, transform_indices = @transform_7, window_bounds = array<i64: 32, 4>}, {pipeline_mode = #tpu.pipeline_mode<synchronous>, transform_indices = @transform_8, window_bounds = array<i64: 32, 1>}, {pipeline_mode = #tpu.pipeline_mode<synchronous>, transform_indices = @transform_9, window_bounds = array<i64: 32, 32>}, {pipeline_mode = #tpu.pipeline_mode<synchronous>, transform_indices = @transform_10, window_bounds = array<i64: 32, 1>}, {pipeline_mode = #tpu.pipeline_mode<synchronous>, transform_indices = @transform_11, window_bounds = array<i64: 32, 32>}, {pipeline_mode = #tpu.pipeline_mode<synchronous>, transform_indices = @transform_12, window_bounds = array<i64: 32, 1>}, {transform_indices = @transform_13, window_bounds = array<i64: 1, 4, 256>}, {transform_indices = @transform_14, window_bounds = array<i64: 1, 1, 32, 1>}]} {
    %c0 = arith.constant 0 : index
    %c0_0 = arith.constant 0 : index
    %c0_1 = arith.constant 0 : index
    %0 = vector.load %arg3[%c0, %c0_0, %c0_1] : memref<1x4x256xf32, #tpu.memory_space<vmem>>, vector<1x4x256xf32>
    %1 = vector.shape_cast %0 : vector<1x4x256xf32> to vector<4x256xf32>
    %c0_2 = arith.constant 0 : index
    %c0_3 = arith.constant 0 : index
    %2 = vector.load %arg4[%c0_2, %c0_3] : memref<32x4xf32, #tpu.memory_space<vmem>>, vector<32x4xf32>
    %3 = vector.extract_strided_slice %2 {offsets = [0, 0], sizes = [32, 1], strides = [1, 1]} : vector<32x4xf32> to vector<32x1xf32>
    %4 = vector.extract_strided_slice %1 {offsets = [0, 0], sizes = [1, 256], strides = [1, 1]} : vector<4x256xf32> to vector<1x256xf32>
    %5 = vector.broadcast %3 : vector<32x1xf32> to vector<32x256xf32>
    %6 = vector.broadcast %4 : vector<1x256xf32> to vector<32x256xf32>
    %7 = arith.mulf %5, %6 : vector<32x256xf32>
    %c0_4 = arith.constant 0 : index
    %c0_5 = arith.constant 0 : index
    %8 = vector.load %arg5[%c0_4, %c0_5] : memref<32x1xf32, #tpu.memory_space<vmem>>, vector<32x1xf32>
    %9 = vector.broadcast %8 : vector<32x1xf32> to vector<32x256xf32>
    %10 = arith.addf %7, %9 : vector<32x256xf32>
    %11 = vector.extract_strided_slice %2 {offsets = [0, 1], sizes = [32, 1], strides = [1, 1]} : vector<32x4xf32> to vector<32x1xf32>
    %12 = vector.extract_strided_slice %1 {offsets = [1, 0], sizes = [1, 256], strides = [1, 1]} : vector<4x256xf32> to vector<1x256xf32>
    %13 = vector.broadcast %11 : vector<32x1xf32> to vector<32x256xf32>
    %14 = vector.broadcast %12 : vector<1x256xf32> to vector<32x256xf32>
    %15 = arith.mulf %13, %14 : vector<32x256xf32>
    %16 = arith.addf %10, %15 : vector<32x256xf32>
    %17 = vector.extract_strided_slice %2 {offsets = [0, 2], sizes = [32, 1], strides = [1, 1]} : vector<32x4xf32> to vector<32x1xf32>
    %18 = vector.extract_strided_slice %1 {offsets = [2, 0], sizes = [1, 256], strides = [1, 1]} : vector<4x256xf32> to vector<1x256xf32>
    %19 = vector.broadcast %17 : vector<32x1xf32> to vector<32x256xf32>
    %20 = vector.broadcast %18 : vector<1x256xf32> to vector<32x256xf32>
    %21 = arith.mulf %19, %20 : vector<32x256xf32>
    %22 = arith.addf %16, %21 : vector<32x256xf32>
    %23 = vector.extract_strided_slice %2 {offsets = [0, 3], sizes = [32, 1], strides = [1, 1]} : vector<32x4xf32> to vector<32x1xf32>
    %24 = vector.extract_strided_slice %1 {offsets = [3, 0], sizes = [1, 256], strides = [1, 1]} : vector<4x256xf32> to vector<1x256xf32>
    %25 = vector.broadcast %23 : vector<32x1xf32> to vector<32x256xf32>
    %26 = vector.broadcast %24 : vector<1x256xf32> to vector<32x256xf32>
    %27 = arith.mulf %25, %26 : vector<32x256xf32>
    %28 = arith.addf %22, %27 : vector<32x256xf32>
    %29 = arith.mulf %28, %28 : vector<32x256xf32>
    %30 = arith.mulf %28, %29 : vector<32x256xf32>
    %cst = arith.constant 4.471500e-02 : f32
    %31 = vector.broadcast %cst : f32 to vector<32x256xf32>
    %32 = arith.mulf %31, %30 : vector<32x256xf32>
    %33 = arith.addf %28, %32 : vector<32x256xf32>
    %cst_6 = arith.constant 0.797884583 : f32
    %34 = vector.broadcast %cst_6 : f32 to vector<32x256xf32>
    %35 = arith.mulf %34, %33 : vector<32x256xf32>
    %36 = math.tanh %35 : vector<32x256xf32>
    %cst_7 = arith.constant 1.000000e+00 : f32
    %37 = vector.broadcast %cst_7 : f32 to vector<32x256xf32>
    %38 = arith.addf %37, %36 : vector<32x256xf32>
    %cst_8 = arith.constant 5.000000e-01 : f32
    %39 = vector.broadcast %cst_8 : f32 to vector<32x256xf32>
    %40 = arith.mulf %39, %38 : vector<32x256xf32>
    %41 = arith.mulf %28, %40 : vector<32x256xf32>
    %c0_9 = arith.constant 0 : index
    %c0_10 = arith.constant 0 : index
    %42 = vector.load %arg6[%c0_9, %c0_10] : memref<32x32xf32, #tpu.memory_space<vmem>>, vector<32x32xf32>
    %cst_11 = arith.constant dense<0.000000e+00> : vector<32x256xf32>
    %43 = tpu.matmul %42, %41, %cst_11 {dimension_numbers = #tpu.dot_dimension_numbers<[1], [0], [0], [1], [0, 0, 1, 1], [], []>} : vector<32x32xf32>, vector<32x256xf32>, vector<32x256xf32> -> vector<32x256xf32>
    %c0_12 = arith.constant 0 : index
    %c0_13 = arith.constant 0 : index
    %44 = vector.load %arg7[%c0_12, %c0_13] : memref<32x1xf32, #tpu.memory_space<vmem>>, vector<32x1xf32>
    %45 = vector.broadcast %44 : vector<32x1xf32> to vector<32x256xf32>
    %46 = arith.addf %43, %45 : vector<32x256xf32>
    %47 = arith.mulf %46, %46 : vector<32x256xf32>
    %48 = arith.mulf %46, %47 : vector<32x256xf32>
    %cst_14 = arith.constant 4.471500e-02 : f32
    %49 = vector.broadcast %cst_14 : f32 to vector<32x256xf32>
    %50 = arith.mulf %49, %48 : vector<32x256xf32>
    %51 = arith.addf %46, %50 : vector<32x256xf32>
    %cst_15 = arith.constant 0.797884583 : f32
    %52 = vector.broadcast %cst_15 : f32 to vector<32x256xf32>
    %53 = arith.mulf %52, %51 : vector<32x256xf32>
    %54 = math.tanh %53 : vector<32x256xf32>
    %cst_16 = arith.constant 1.000000e+00 : f32
    %55 = vector.broadcast %cst_16 : f32 to vector<32x256xf32>
    %56 = arith.addf %55, %54 : vector<32x256xf32>
    %cst_17 = arith.constant 5.000000e-01 : f32
    %57 = vector.broadcast %cst_17 : f32 to vector<32x256xf32>
    %58 = arith.mulf %57, %56 : vector<32x256xf32>
    %59 = arith.mulf %46, %58 : vector<32x256xf32>
    %c0_18 = arith.constant 0 : index
    %c0_19 = arith.constant 0 : index
    %60 = vector.load %arg8[%c0_18, %c0_19] : memref<4x32xf32, #tpu.memory_space<vmem>>, vector<4x32xf32>
    %cst_20 = arith.constant dense<0.000000e+00> : vector<4x256xf32>
    %61 = tpu.matmul %60, %59, %cst_20 {dimension_numbers = #tpu.dot_dimension_numbers<[1], [0], [0], [1], [0, 0, 1, 1], [], []>} : vector<4x32xf32>, vector<32x256xf32>, vector<4x256xf32> -> vector<4x256xf32>
    %c0_21 = arith.constant 0 : index
    %c0_22 = arith.constant 0 : index
    %62 = vector.load %arg9[%c0_21, %c0_22] : memref<4x1xf32, #tpu.memory_space<vmem>>, vector<4x1xf32>
    %63 = vector.broadcast %62 : vector<4x1xf32> to vector<4x256xf32>
    %64 = arith.addf %61, %63 : vector<4x256xf32>
    %cst_23 = arith.constant 0.000000e+00 : f32
    %65 = vector.broadcast %cst_23 : f32 to vector<4x256xf32>
    %66 = arith.subf %65, %64 : vector<4x256xf32>
    %67 = math.exp %66 : vector<4x256xf32>
    %cst_24 = arith.constant 1.000000e+00 : f32
    %68 = vector.broadcast %cst_24 : f32 to vector<4x256xf32>
    %69 = arith.addf %68, %67 : vector<4x256xf32>
    %70 = tpu.reciprocal %69 {approx = true} : vector<4x256xf32> -> vector<4x256xf32>
    %71 = vector.shape_cast %70 : vector<4x256xf32> to vector<1x4x256xf32>
    %c0_25 = arith.constant 0 : index
    %c0_26 = arith.constant 0 : index
    %c0_27 = arith.constant 0 : index
    %72 = vector.load %arg16[%c0_25, %c0_26, %c0_27] : memref<1x4x256xf32, #tpu.memory_space<vmem>>, vector<1x4x256xf32>
    tpu.vector_store %arg16[%c0_25, %c0_26, %c0_27], %71 {strides = array<i32>} : memref<1x4x256xf32, #tpu.memory_space<vmem>>, vector<1x4x256xf32>,
    %73 = arith.mulf %1, %70 : vector<4x256xf32>
    %c0_28 = arith.constant 0 : index
    %c0_29 = arith.constant 0 : index
    %74 = vector.load %arg10[%c0_28, %c0_29] : memref<32x4xf32, #tpu.memory_space<vmem>>, vector<32x4xf32>
    %75 = vector.extract_strided_slice %74 {offsets = [0, 0], sizes = [32, 1], strides = [1, 1]} : vector<32x4xf32> to vector<32x1xf32>
    %76 = vector.extract_strided_slice %73 {offsets = [0, 0], sizes = [1, 256], strides = [1, 1]} : vector<4x256xf32> to vector<1x256xf32>
    %77 = vector.broadcast %75 : vector<32x1xf32> to vector<32x256xf32>
    %78 = vector.broadcast %76 : vector<1x256xf32> to vector<32x256xf32>
    %79 = arith.mulf %77, %78 : vector<32x256xf32>
    %c0_30 = arith.constant 0 : index
    %c0_31 = arith.constant 0 : index
    %80 = vector.load %arg11[%c0_30, %c0_31] : memref<32x1xf32, #tpu.memory_space<vmem>>, vector<32x1xf32>
    %81 = vector.broadcast %80 : vector<32x1xf32> to vector<32x256xf32>
    %82 = arith.addf %79, %81 : vector<32x256xf32>
    %83 = vector.extract_strided_slice %74 {offsets = [0, 1], sizes = [32, 1], strides = [1, 1]} : vector<32x4xf32> to vector<32x1xf32>
    %84 = vector.extract_strided_slice %73 {offsets = [1, 0], sizes = [1, 256], strides = [1, 1]} : vector<4x256xf32> to vector<1x256xf32>
    %85 = vector.broadcast %83 : vector<32x1xf32> to vector<32x256xf32>
    %86 = vector.broadcast %84 : vector<1x256xf32> to vector<32x256xf32>
    %87 = arith.mulf %85, %86 : vector<32x256xf32>
    %88 = arith.addf %82, %87 : vector<32x256xf32>
    %89 = vector.extract_strided_slice %74 {offsets = [0, 2], sizes = [32, 1], strides = [1, 1]} : vector<32x4xf32> to vector<32x1xf32>
    %90 = vector.extract_strided_slice %73 {offsets = [2, 0], sizes = [1, 256], strides = [1, 1]} : vector<4x256xf32> to vector<1x256xf32>
    %91 = vector.broadcast %89 : vector<32x1xf32> to vector<32x256xf32>
    %92 = vector.broadcast %90 : vector<1x256xf32> to vector<32x256xf32>
    %93 = arith.mulf %91, %92 : vector<32x256xf32>
    %94 = arith.addf %88, %93 : vector<32x256xf32>
    %95 = vector.extract_strided_slice %74 {offsets = [0, 3], sizes = [32, 1], strides = [1, 1]} : vector<32x4xf32> to vector<32x1xf32>
    %96 = vector.extract_strided_slice %73 {offsets = [3, 0], sizes = [1, 256], strides = [1, 1]} : vector<4x256xf32> to vector<1x256xf32>
    %97 = vector.broadcast %95 : vector<32x1xf32> to vector<32x256xf32>
    %98 = vector.broadcast %96 : vector<1x256xf32> to vector<32x256xf32>
    %99 = arith.mulf %97, %98 : vector<32x256xf32>
    %100 = arith.addf %94, %99 : vector<32x256xf32>
    %101 = arith.mulf %100, %100 : vector<32x256xf32>
    %102 = arith.mulf %100, %101 : vector<32x256xf32>
    %cst_32 = arith.constant 4.471500e-02 : f32
    %103 = vector.broadcast %cst_32 : f32 to vector<32x256xf32>
    %104 = arith.mulf %103, %102 : vector<32x256xf32>
    %105 = arith.addf %100, %104 : vector<32x256xf32>
    %cst_33 = arith.constant 0.797884583 : f32
    %106 = vector.broadcast %cst_33 : f32 to vector<32x256xf32>
    %107 = arith.mulf %106, %105 : vector<32x256xf32>
    %108 = math.tanh %107 : vector<32x256xf32>
    %cst_34 = arith.constant 1.000000e+00 : f32
    %109 = vector.broadcast %cst_34 : f32 to vector<32x256xf32>
    %110 = arith.addf %109, %108 : vector<32x256xf32>
    %cst_35 = arith.constant 5.000000e-01 : f32
    %111 = vector.broadcast %cst_35 : f32 to vector<32x256xf32>
    %112 = arith.mulf %111, %110 : vector<32x256xf32>
    %113 = arith.mulf %100, %112 : vector<32x256xf32>
    %c0_36 = arith.constant 0 : index
    %c0_37 = arith.constant 0 : index
    %114 = vector.load %arg12[%c0_36, %c0_37] : memref<32x32xf32, #tpu.memory_space<vmem>>, vector<32x32xf32>
    %cst_38 = arith.constant dense<0.000000e+00> : vector<32x256xf32>
    %115 = tpu.matmul %114, %113, %cst_38 {dimension_numbers = #tpu.dot_dimension_numbers<[1], [0], [0], [1], [0, 0, 1, 1], [], []>} : vector<32x32xf32>, vector<32x256xf32>, vector<32x256xf32> -> vector<32x256xf32>
    %c0_39 = arith.constant 0 : index
    %c0_40 = arith.constant 0 : index
    %116 = vector.load %arg13[%c0_39, %c0_40] : memref<32x1xf32, #tpu.memory_space<vmem>>, vector<32x1xf32>
    %117 = vector.broadcast %116 : vector<32x1xf32> to vector<32x256xf32>
    %118 = arith.addf %115, %117 : vector<32x256xf32>
    %119 = arith.mulf %118, %118 : vector<32x256xf32>
    %120 = arith.mulf %118, %119 : vector<32x256xf32>
    %cst_41 = arith.constant 4.471500e-02 : f32
    %121 = vector.broadcast %cst_41 : f32 to vector<32x256xf32>
    %122 = arith.mulf %121, %120 : vector<32x256xf32>
    %123 = arith.addf %118, %122 : vector<32x256xf32>
    %cst_42 = arith.constant 0.797884583 : f32
    %124 = vector.broadcast %cst_42 : f32 to vector<32x256xf32>
    %125 = arith.mulf %124, %123 : vector<32x256xf32>
    %126 = math.tanh %125 : vector<32x256xf32>
    %cst_43 = arith.constant 1.000000e+00 : f32
    %127 = vector.broadcast %cst_43 : f32 to vector<32x256xf32>
    %128 = arith.addf %127, %126 : vector<32x256xf32>
    %cst_44 = arith.constant 5.000000e-01 : f32
    %129 = vector.broadcast %cst_44 : f32 to vector<32x256xf32>
    %130 = arith.mulf %129, %128 : vector<32x256xf32>
    %131 = arith.mulf %118, %130 : vector<32x256xf32>
    %c0_45 = arith.constant 0 : index
    %c0_46 = arith.constant 0 : index
    %132 = vector.load %arg14[%c0_45, %c0_46] : memref<32x32xf32, #tpu.memory_space<vmem>>, vector<32x32xf32>
    %cst_47 = arith.constant dense<0.000000e+00> : vector<32x256xf32>
    %133 = tpu.matmul %132, %131, %cst_47 {dimension_numbers = #tpu.dot_dimension_numbers<[1], [0], [0], [1], [0, 0, 1, 1], [], []>} : vector<32x32xf32>, vector<32x256xf32>, vector<32x256xf32> -> vector<32x256xf32>
    %c0_48 = arith.constant 0 : index
    %c0_49 = arith.constant 0 : index
    %134 = vector.load %arg15[%c0_48, %c0_49] : memref<32x1xf32, #tpu.memory_space<vmem>>, vector<32x1xf32>
    %135 = vector.broadcast %134 : vector<32x1xf32> to vector<32x256xf32>
    %136 = arith.addf %133, %135 : vector<32x256xf32>
    %137 = arith.addf %113, %136 : vector<32x256xf32>
    %cst_50 = arith.constant dense<0.000000e+00> : vector<32xf32>
    %138 = vector.multi_reduction <add>, %137, %cst_50 [1] : vector<32x256xf32> to vector<32xf32>
    %139 = vector.shape_cast %138 : vector<32xf32> to vector<32x1xf32>
    %cst_51 = arith.constant 3.906250e-03 : f32
    %140 = vector.broadcast %cst_51 : f32 to vector<32x1xf32>
    %141 = arith.mulf %139, %140 : vector<32x1xf32>
    %c0_i32 = arith.constant 0 : i32
    %142 = arith.cmpi eq, %arg2, %c0_i32 : i32
    %143 = arith.extui %142 : i1 to i32
    %c0_i32_52 = arith.constant 0 : i32
    %144 = arith.cmpi ne, %143, %c0_i32_52 : i32
    scf.if %144 {
      %cst_61 = arith.constant 0.000000e+00 : f32
      %149 = vector.broadcast %cst_61 : f32 to vector<1x1x32x1xf32>
      %c0_62 = arith.constant 0 : index
      %c0_63 = arith.constant 0 : index
      %c0_64 = arith.constant 0 : index
      %c0_65 = arith.constant 0 : index
      %150 = vector.load %arg17[%c0_62, %c0_63, %c0_64, %c0_65] : memref<1x1x32x1xf32, #tpu.memory_space<vmem>>, vector<1x1x32x1xf32>
      tpu.vector_store %arg17[%c0_62, %c0_63, %c0_64, %c0_65], %149 {strides = array<i32>} : memref<1x1x32x1xf32, #tpu.memory_space<vmem>>, vector<1x1x32x1xf32>,
    } else {
    }
    %c0_53 = arith.constant 0 : index
    %c0_54 = arith.constant 0 : index
    %c0_55 = arith.constant 0 : index
    %c0_56 = arith.constant 0 : index
    %145 = vector.load %arg17[%c0_53, %c0_54, %c0_55, %c0_56] : memref<1x1x32x1xf32, #tpu.memory_space<vmem>>, vector<1x1x32x1xf32>
    %146 = vector.shape_cast %141 : vector<32x1xf32> to vector<1x1x32x1xf32>
    %147 = arith.addf %145, %146 : vector<1x1x32x1xf32>
    %c0_57 = arith.constant 0 : index
    %c0_58 = arith.constant 0 : index
    %c0_59 = arith.constant 0 : index
    %c0_60 = arith.constant 0 : index
    %148 = vector.load %arg17[%c0_57, %c0_58, %c0_59, %c0_60] : memref<1x1x32x1xf32, #tpu.memory_space<vmem>>, vector<1x1x32x1xf32>
    tpu.vector_store %arg17[%c0_57, %c0_58, %c0_59, %c0_60], %147 {strides = array<i32>} : memref<1x1x32x1xf32, #tpu.memory_space<vmem>>, vector<1x1x32x1xf32>,
    return
  }
  func.func @transform_0(%arg0: i32, %arg1: i32, %arg2: i32) -> (i32, i32, i32) {
    %c1_i32 = arith.constant 1 : i32
    %0 = arith.muli %arg0, %c1_i32 : i32
    %1 = arith.addi %0, %arg2 : i32
    %c0_i32 = arith.constant 0 : i32
    %c0_i32_0 = arith.constant 0 : i32
    return %arg1, %c0_i32, %1 : i32, i32, i32
  }
  func.func @transform_1(%arg0: i32, %arg1: i32, %arg2: i32) -> (i32, i32) {
    %c0_i32 = arith.constant 0 : i32
    %c0_i32_0 = arith.constant 0 : i32
    %c0_i32_1 = arith.constant 0 : i32
    return %c0_i32, %c0_i32_0 : i32, i32
  }
  func.func @transform_2(%arg0: i32, %arg1: i32, %arg2: i32) -> (i32, i32) {
    %c0_i32 = arith.constant 0 : i32
    %c0_i32_0 = arith.constant 0 : i32
    %c0_i32_1 = arith.constant 0 : i32
    return %c0_i32, %c0_i32_0 : i32, i32
  }
  func.func @transform_3(%arg0: i32, %arg1: i32, %arg2: i32) -> (i32, i32) {
    %c0_i32 = arith.constant 0 : i32
    %c0_i32_0 = arith.constant 0 : i32
    %c0_i32_1 = arith.constant 0 : i32
    return %c0_i32, %c0_i32_0 : i32, i32
  }
  func.func @transform_4(%arg0: i32, %arg1: i32, %arg2: i32) -> (i32, i32) {
    %c0_i32 = arith.constant 0 : i32
    %c0_i32_0 = arith.constant 0 : i32
    %c0_i32_1 = arith.constant 0 : i32
    return %c0_i32, %c0_i32_0 : i32, i32
  }
  func.func @transform_5(%arg0: i32, %arg1: i32, %arg2: i32) -> (i32, i32) {
    %c0_i32 = arith.constant 0 : i32
    %c0_i32_0 = arith.constant 0 : i32
    %c0_i32_1 = arith.constant 0 : i32
    return %c0_i32, %c0_i32_0 : i32, i32
  }
  func.func @transform_6(%arg0: i32, %arg1: i32, %arg2: i32) -> (i32, i32) {
    %c0_i32 = arith.constant 0 : i32
    %c0_i32_0 = arith.constant 0 : i32
    %c0_i32_1 = arith.constant 0 : i32
    return %c0_i32, %c0_i32_0 : i32, i32
  }
  func.func @transform_7(%arg0: i32, %arg1: i32, %arg2: i32) -> (i32, i32) {
    %c0_i32 = arith.constant 0 : i32
    %c0_i32_0 = arith.constant 0 : i32
    %c0_i32_1 = arith.constant 0 : i32
    return %c0_i32, %c0_i32_0 : i32, i32
  }
  func.func @transform_8(%arg0: i32, %arg1: i32, %arg2: i32) -> (i32, i32) {
    %c0_i32 = arith.constant 0 : i32
    %c0_i32_0 = arith.constant 0 : i32
    %c0_i32_1 = arith.constant 0 : i32
    return %c0_i32, %c0_i32_0 : i32, i32
  }
  func.func @transform_9(%arg0: i32, %arg1: i32, %arg2: i32) -> (i32, i32) {
    %c0_i32 = arith.constant 0 : i32
    %c0_i32_0 = arith.constant 0 : i32
    %c0_i32_1 = arith.constant 0 : i32
    return %c0_i32, %c0_i32_0 : i32, i32
  }
  func.func @transform_10(%arg0: i32, %arg1: i32, %arg2: i32) -> (i32, i32) {
    %c0_i32 = arith.constant 0 : i32
    %c0_i32_0 = arith.constant 0 : i32
    %c0_i32_1 = arith.constant 0 : i32
    return %c0_i32, %c0_i32_0 : i32, i32
  }
  func.func @transform_11(%arg0: i32, %arg1: i32, %arg2: i32) -> (i32, i32) {
    %c0_i32 = arith.constant 0 : i32
    %c0_i32_0 = arith.constant 0 : i32
    %c0_i32_1 = arith.constant 0 : i32
    return %c0_i32, %c0_i32_0 : i32, i32
  }
  func.func @transform_12(%arg0: i32, %arg1: i32, %arg2: i32) -> (i32, i32) {
    %c0_i32 = arith.constant 0 : i32
    %c0_i32_0 = arith.constant 0 : i32
    %c0_i32_1 = arith.constant 0 : i32
    return %c0_i32, %c0_i32_0 : i32, i32
  }
  func.func @transform_13(%arg0: i32, %arg1: i32, %arg2: i32) -> (i32, i32, i32) {
    %c1_i32 = arith.constant 1 : i32
    %0 = arith.muli %arg0, %c1_i32 : i32
    %1 = arith.addi %0, %arg2 : i32
    %c0_i32 = arith.constant 0 : i32
    %c0_i32_0 = arith.constant 0 : i32
    return %arg1, %c0_i32, %1 : i32, i32, i32
  }
  func.func @transform_14(%arg0: i32, %arg1: i32, %arg2: i32) -> (i32, i32, i32, i32) {
    %c0_i32 = arith.constant 0 : i32
    %c0_i32_0 = arith.constant 0 : i32
    %c0_i32_1 = arith.constant 0 : i32
    return %arg0, %arg1, %c0_i32, %c0_i32_0 : i32, i32, i32, i32
  }
}

</mosaic_0001>

<bundles_post_ra>
// kernel: gavig_forward.1
= control target key start
LH: loop header
LB: loop body
LE: loop exit
PB: predicated region body
PF: predicated region fallthrough
CT: control target
= control target key end

     0   :  { %s2052_s29 = smov 0   ;;  %s2054_s30 = smov 0   ;;  %s2646_s0 = inlined_call_operand.vmem [shape: f32[2,4,256], index: 0, kind: input, shape index: {}]   ;;  %s2647_s1 = inlined_call_operand.vmem [shape: f32[32,4], index: 1, kind: input, shape index: {}]   ;;  %s2648_s2 = inlined_call_operand.vmem [shape: f32[32,1], index: 2, kind: input, shape index: {}]   ;;  %s2649_s3 = inlined_call_operand.vmem [shape: f32[32,32], index: 3, kind: input, shape index: {}]   ;;  %s2650_s4 = inlined_call_operand.vmem [shape: f32[32,1], index: 4, kind: input, shape index: {}]   ;;  %s2651_s5 = inlined_call_operand.vmem [shape: f32[4,32], index: 5, kind: input, shape index: {}]   ;;  %s2652_s6 = inlined_call_operand.vmem [shape: f32[4,1], index: 6, kind: input, shape index: {}]   ;;  %s2653_s7 = inlined_call_operand.vmem [shape: f32[32,4], index: 7, kind: input, shape index: {}]   ;;  %s2654_s8 = inlined_call_operand.vmem [shape: f32[32,1], index: 8, kind: input, shape index: {}]   ;;  %s2655_s9 = inlined_call_operand.vmem [shape: f32[32,32], index: 9, kind: input, shape index: {}]   ;;  %s2656_s10 = inlined_call_operand.vmem [shape: f32[32,1], index: 10, kind: input, shape index: {}]   ;;  %s2657_s11 = inlined_call_operand.vmem [shape: f32[32,32], index: 11, kind: input, shape index: {}]   ;;  %s2658_s12 = inlined_call_operand.vmem [shape: f32[32,1], index: 12, kind: input, shape index: {}]   ;;  %s2659_s13 = inlined_call_operand.vmem [shape: f32[2,4,256], index: 13, kind: output, shape index: {0}]   ;;  %s2660_s14 = inlined_call_operand.vmem [shape: f32[1,2,32,1], index: 14, kind: output, shape index: {1}]  }
   0x1   :  { %s2056_s15 = smov 0  }
   0x2 LB: > { %s40_s16 = sadd.s32 1, %s1966_s30  ;;  %p1767_p0 = scmp.ge.s32.totalorder %s1970_s15, 1  ;;  %s1970_s15 = sphi %s2056_s15, %s25_s15   ;;  %s1966_s30 = sphi %s2054_s30, %s2662_s30   ;;  %s1962_s29 = sphi %s2052_s29, %s2661_s29  }
   0x3   : > { %p42_p1 = scmp.ge.s32.totalorder %s40_s16, 2  ;;  %p451_p2 = scmp.lt.s32.totalorder %s1970_s15, 3 }
   0x5   : > { %s2664_s16 = smov (%p42_p1, %s40_s16), 0  ;;  %p452_p3 = pnand %p1767_p0, %p451_p2 }
   0x6   : > { %p518_p4 = scmp.lt.s32.totalorder (!%p452_p3), %s1962_s29, 1 }
   0x7   : > { %455 = sbr.rel (%p452_p3) target bundleno = 1071 (0x42f), region = 72 }
   0xc   : > { %v592_v0 = vld [vmem:[%s2648_s2 + $0x18] sm:$0xff]  ;;  %v551_v2 = vld [vmem:[%s2647_s1 + $0x8] sm:$0xff]  ;;  %v1972_v3 = vmov 0   ;;  %v552_v4 = vld [vmem:[%s2647_s1 + $0x10] sm:$0xff]  ;;  %v1973_v6 = vmov 1   ;;  %v1974_v8 = vmov 2  }
   0xd   : > { %v553_v1 = vld [vmem:[%s2647_s1 + $0x18] sm:$0xff]  ;;  %1843 = vset.pattern.permute.xlu1 %v1972_v3  ;;  %1842 = vset.pattern.permute.xlu0 %v1972_v3  ;;  %v591_v5 = vld [vmem:[%s2648_s2 + $0x10] sm:$0xff]  ;;  %v550_v7 = vld [vmem:[%s2647_s1] sm:$0xff]  ;;  %v1975_v11 = vmov 3   ;;  %s2666_s29 = smov (!%p518_p4, %s1962_s29), 1  ;;  %vm835_vm0 = vcmask 261120  }
   0xe   : > { %1845 = vset.pattern.permute.xlu2 %v1972_v3  ;;  %610 = vperm.xlu1 %1843, %v592_v0   ;;  %v590_v9 = vld [vmem:[%s2648_s2 + $0x8] sm:$0xff]  ;;  %v589_v10 = vld [vmem:[%s2648_s2] sm:$0xff]  ;;  %s1802_s21 = sshll.u32 %s2666_s29, 3  ;;  %vm1041_vm1 = vcmask 1043456   ;;  %s1804_s27 = sshll.u32 %s2666_s29, 5  ;;  %vm1599_vm2 = vcmask 7168  }
   0xf   : > { %571 = vperm.xlu0 %1842, %v553_v1   ;;  %561 = vperm.xlu2 %1845, %v551_v2   ;;  %s525_s24 = scalar_lea.vmem %s2646_s0, %s1802_s21  ;;  %s537_s18 = scalar_lea.vmem %s2659_s13, %s1802_s21 }
  0x10   : > { %v2130_v21 = vld [vmem:[%s525_s24] sm:$0xff] }
  0x11   : > { %v575_v22 = vperm.slane %v2130_v21, 0  ;;  %v576_v23 = vperm.slane %v2130_v21, 4  ;;  %v637_v26 = vperm.slane %v2130_v21, 1  ;;  %v638_v27 = vperm.slane %v2130_v21, 5 }
  0x12   : > { %v675_v31 = vperm.slane %v2130_v21, 2  ;;  %v676_v32 = vperm.slane %v2130_v21, 6  ;;  %v713_v33 = vperm.slane %v2130_v21, 3  ;;  %v714_v34 = vperm.slane %v2130_v21, 7 }
  0x13   : > { %v2136_v28 = vperm.slane %v575_v22, 0  ;;  %v2138_v29 = vperm.slane %v576_v23, 0  ;;  %v2144_v35 = vperm.slane %v637_v26, 1  ;;  %v2146_v36 = vperm.slane %v638_v27, 1 }
  0x14   : > { %v2154_v43 = vperm.slane %v675_v31, 2  ;;  %v2156_v44 = vperm.slane %v676_v32, 2  ;;  %v2158_v47 = vperm.slane %v713_v33, 3  ;;  %v2160_v48 = vperm.slane %v714_v34, 3 }
  0x16   : > { %1844 = vset.pattern.permute.xlu1 %v1973_v6 }
  0x17   : > { %566 = vperm.xlu0 %1842, %v552_v4   ;;  %634 = vperm.xlu1 %1844, %v553_v1  }
  0x18   : > { %605 = vperm.xlu2 %1845, %v591_v5  }
  0x1f   : > { %1846 = vset.pattern.permute.xlu0 %v1973_v6  ;;  %1847 = vset.pattern.permute.xlu1 %v1974_v8 }
  0x20   : > { %630 = vperm.xlu0 %1846, %v552_v4   ;;  %556 = vperm.xlu2 %1845, %v550_v7  }
  0x21   : > { %672 = vperm.xlu1 %1847, %v553_v1  }
  0x28   : > { %1850 = vset.pattern.permute.xlu0 %v1974_v8  ;;  %1849 = vset.pattern.permute.xlu2 %v1973_v6 }
  0x29   : > { %1848 = vset.pattern.permute.xlu1 %v1972_v3  ;;  %668 = vperm.xlu0 %1850, %v552_v4  }
  0x2a   : > { %626 = vperm.xlu2 %1849, %v551_v2   ;;  %600 = vperm.xlu1 %1848, %v590_v9  }
  0x31   : > { %1855 = vset.pattern.permute.xlu0 %v1975_v11 }
  0x32   : > { %1852 = vset.pattern.permute.xlu2 %v1972_v3  ;;  %1851 = vset.pattern.permute.xlu1 %v1975_v11 }
  0x33   : > { %706 = vperm.xlu0 %1855, %v552_v4   ;;  %595 = vperm.xlu2 %1852, %v589_v10  }
  0x34   : > { %710 = vperm.xlu1 %1851, %v553_v1  }
  0x3b   : > { %1854 = vset.pattern.permute.xlu2 %v1974_v8  ;;  %1860 = vset.pattern.permute.xlu0 %v1972_v3 }
  0x3c   : > { %1853 = vset.pattern.permute.xlu1 %v1973_v6  ;;  %664 = vperm.xlu2 %1854, %v551_v2  }
  0x3d   : > { %622 = vperm.xlu1 %1853, %v550_v7  }
  0x44   : > { %1857 = vset.pattern.permute.xlu2 %v1975_v11 }
  0x45   : > { %1856 = vset.pattern.permute.xlu1 %v1974_v8  ;;  %702 = vperm.xlu2 %1857, %v551_v2  }
  0x46   : > { %660 = vperm.xlu1 %1856, %v550_v7  }
  0x4d   : > { %1859 = vset.pattern.permute.xlu2 %v1972_v3 }
  0x4e   : > { %1858 = vset.pattern.permute.xlu1 %v1975_v11 }
  0x4f   : > { %698 = vperm.xlu1 %1858, %v550_v7  }
  0x57   : > { %1861 = vset.pattern.permute.xlu1 %v1972_v3 }
  0x69   : > { %v562_v12 = vpop.permute.xlu2 %561 }
  0x6a   : > { %v583_v37 = vmul.f32 %v2136_v28, %v562_v12  ;;  %v584_v38 = vmul.f32 %v2138_v29, %v562_v12 }
  0x72   : > { %v606_v13 = vpop.permute.xlu2 %605 }
  0x7a   : > { %v2116_v14 = vpop.permute.xlu2 %556 }
  0x80   : > { %v611_v15 = vpop.permute.xlu1 %610 }
  0x81   : > { %v572_v16 = vpop.permute.xlu0 %571 }
  0x82   : > { %v587_v39 = vmul.f32 %v2136_v28, %v572_v16  ;;  %v588_v40 = vmul.f32 %v2138_v29, %v572_v16 }
  0x84   : > { %v627_v17 = vpop.permute.xlu2 %626  ;;  %v619_v53 = vadd.f32 %v611_v15, %v587_v39  ;;  %v620_v54 = vadd.f32 %v611_v15, %v588_v40 }
  0x85   : > { %v645_v41 = vmul.f32 %v2144_v35, %v627_v17  ;;  %v646_v42 = vmul.f32 %v2146_v36, %v627_v17 }
  0x89   : > { %v567_v18 = vpop.permute.xlu0 %566  ;;  %v635_v19 = vpop.permute.xlu1 %634 }
  0x8a   : > { %v585_v55 = vmul.f32 %v2136_v28, %v567_v18  ;;  %v586_v56 = vmul.f32 %v2138_v29, %v567_v18  ;;  %v649_v57 = vmul.f32 %v2144_v35, %v635_v19  ;;  %v650_v58 = vmul.f32 %v2146_v36, %v635_v19 }
  0x8c   : > { %v617_v9 = vadd.f32 %v606_v13, %v585_v55  ;;  %v618_v10 = vadd.f32 %v606_v13, %v586_v56  ;;  %v657_v16 = vadd.f32 %v649_v57, %v619_v53  ;;  %v658_v17 = vadd.f32 %v650_v58, %v620_v54 }
  0x8d   : > { %v2128_v20 = vpop.permute.xlu2 %595 }
  0x92   : > { %v631_v24 = vpop.permute.xlu0 %630 }
  0x93   : > { %v673_v25 = vpop.permute.xlu1 %672  ;;  %v647_v62 = vmul.f32 %v2144_v35, %v631_v24  ;;  %v648_v63 = vmul.f32 %v2146_v36, %v631_v24 }
  0x94   : > { %v687_v2 = vmul.f32 %v2154_v43, %v673_v25  ;;  %v688_v4 = vmul.f32 %v2156_v44, %v673_v25 }
  0x95   : > { %v655_v22 = vadd.f32 %v647_v62, %v617_v9  ;;  %v656_v23 = vadd.f32 %v648_v63, %v618_v10 }
  0x96   : > { %v665_v30 = vpop.permute.xlu2 %664  ;;  %v695_v24 = vadd.f32 %v687_v2, %v657_v16  ;;  %v696_v26 = vadd.f32 %v688_v4, %v658_v17 }
  0x97   : > { %v683_v49 = vmul.f32 %v2154_v43, %v665_v30  ;;  %v684_v50 = vmul.f32 %v2156_v44, %v665_v30 }
  0x9b   : > { %v669_v45 = vpop.permute.xlu0 %668 }
  0x9c   : > { %v601_v46 = vpop.permute.xlu1 %600  ;;  %v685_v12 = vmul.f32 %v2154_v43, %v669_v45  ;;  %v686_v15 = vmul.f32 %v2156_v44, %v669_v45 }
  0x9d   : > { %v615_v51 = vadd.f32 %v601_v46, %v583_v37  ;;  %v616_v52 = vadd.f32 %v601_v46, %v584_v38 }
  0x9e   : > { %v693_v30 = vadd.f32 %v685_v12, %v655_v22  ;;  %v694_v31 = vadd.f32 %v686_v15, %v656_v23 }
  0x9f   : > { %v653_v59 = vadd.f32 %v645_v41, %v615_v51  ;;  %v654_v60 = vadd.f32 %v646_v42, %v616_v52  ;;  %v703_v61 = vpop.permute.xlu2 %702  ;;  %v812_v41 = vld [vmem:[%s2650_s4 + $0x8] sm:$0xff] }
  0xa0   : > { %v721_v0 = vmul.f32 %v2158_v47, %v703_v61  ;;  %v722_v1 = vmul.f32 %v2160_v48, %v703_v61  ;;  %822 = vperm.xlu1 %1861, %v812_v41  }
  0xa1   : > { %v691_v5 = vadd.f32 %v683_v49, %v653_v59  ;;  %v692_v7 = vadd.f32 %v684_v50, %v654_v60 }
  0xa3   : > { %v2176_v18 = vadd.f32 %v721_v0, %v691_v5  ;;  %v2178_v19 = vadd.f32 %v722_v1, %v692_v7 }
  0xa5   : > { %v707_v27 = vpop.permute.xlu0 %706  ;;  %v737_v25 = vmul.f32 %v2176_v18, %v2176_v18  ;;  %v738_v13 = vmul.f32 %v2178_v19, %v2178_v19 }
  0xa6   : > { %v723_v32 = vmul.f32 %v2158_v47, %v707_v27  ;;  %v724_v33 = vmul.f32 %v2160_v48, %v707_v27  ;;  %v711_v34 = vpop.permute.xlu1 %710 }
  0xa7   : > { %v725_v37 = vmul.f32 %v2158_v47, %v711_v34  ;;  %v726_v38 = vmul.f32 %v2160_v48, %v711_v34  ;;  %v745_v39 = vmul.f32 %v737_v25, %v2176_v18  ;;  %v746_v40 = vmul.f32 %v738_v13, %v2178_v19 }
  0xa8   : > { %v2193_v42 = vadd.f32 %v723_v32, %v693_v30  ;;  %v2195_v45 = vadd.f32 %v724_v33, %v694_v31 }
  0xa9   : > { %v733_v46 = vadd.f32 %v725_v37, %v695_v24  ;;  %v2197_v49 = vadd.f32 %v726_v38, %v696_v26  ;;  %v753_v50 = vmul.f32 0.044715, %v745_v39  ;;  %v754_v51 = vmul.f32 0.044715, %v746_v40 }
  0xaa   : > { %v739_v52 = vmul.f32 %v2193_v42, %v2193_v42  ;;  %v740_v53 = vmul.f32 %v2195_v45, %v2195_v45  ;;  %v581_v24 = vmul.f32 %v2136_v28, %v2116_v14  ;;  %v582_v26 = vmul.f32 %v2138_v29, %v2116_v14 }
  0xab   : > { %v741_v54 = vmul.f32 %v733_v46, %v733_v46  ;;  %v742_v55 = vmul.f32 %v2197_v49, %v2197_v49  ;;  %v761_v56 = vadd.f32 %v753_v50, %v2176_v18  ;;  %v762_v57 = vadd.f32 %v754_v51, %v2178_v19 }
  0xac   : > { %v747_v58 = vmul.f32 %v739_v52, %v2193_v42  ;;  %v748_v59 = vmul.f32 %v740_v53, %v2195_v45  ;;  %v613_v37 = vadd.f32 %v2128_v20, %v581_v24  ;;  %v614_v38 = vadd.f32 %v2128_v20, %v582_v26  ;;  %v979_v20 = vld [vmem:[%s2652_s6] sm:$0xf] }
  0xad   : > { %v749_v60 = vmul.f32 %v741_v54, %v733_v46  ;;  %v750_v61 = vmul.f32 %v742_v55, %v2197_v49  ;;  %v769_v0 = vmul.f32 0.7978846, %v761_v56  ;;  %v770_v5 = vmul.f32 0.7978846, %v762_v57  ;;  %982 = vperm.xlu1 %1861, %v979_v20   ;;  %v2259_v24 = vld [vmem:[%s2653_s7] sm:$0xff] }
  0xae   : > { %v755_v62 = vmul.f32 0.044715, %v747_v58  ;;  %v756_v63 = vmul.f32 0.044715, %v748_v59 }
  0xaf   : > { %v623_v1 = vpop.permute.xlu1 %622  ;;  %v757_v2 = vmul.f32 0.044715, %v749_v60  ;;  %v758_v4 = vmul.f32 0.044715, %v750_v61  ;;  %1876 = vtanh.f32 %v769_v0 }
  0xb0   : > { %v763_v7 = vadd.f32 %v755_v62, %v2193_v42  ;;  %v764_v9 = vadd.f32 %v756_v63, %v2195_v45  ;;  %1878 = vtanh.f32 %v770_v5  ;;  %v643_v31 = vmul.f32 %v2144_v35, %v623_v1 }
  0xb1   : > { %v765_v10 = vadd.f32 %v757_v2, %v733_v46  ;;  %v766_v12 = vadd.f32 %v758_v4, %v2197_v49  ;;  %v644_v32 = vmul.f32 %v2146_v36, %v623_v1 }
  0xb2   : > { %v771_v15 = vmul.f32 0.7978846, %v763_v7  ;;  %v772_v22 = vmul.f32 0.7978846, %v764_v9  ;;  %v651_v53 = vadd.f32 %v643_v31, %v613_v37  ;;  %v810_v37 = vld [vmem:[%s2649_s3 + $0x18] sm:$0xff] }
  0xb3   : > { %v773_v16 = vmul.f32 0.7978846, %v765_v10  ;;  %v774_v17 = vmul.f32 0.7978846, %v766_v12  ;;  %v652_v36 = vadd.f32 %v644_v32, %v614_v38  ;;  %v1049_v38 = vld [vmem:[%s2653_s7 + $0x18] sm:$0xff] }
  0xb4   : > { %1880 = vtanh.f32 %v771_v15  ;;  %v2242_v15 = vld [vmem:[%s2653_s7 + $0x10] sm:$0xff] }
  0xb5   : > { %1882 = vtanh.f32 %v773_v16  ;;  %v1877_v23 = vpop.eup %1876  ;;  %v1087_v16 = vld [vmem:[%s2654_s8 + $0x10] sm:$0xff] }
  0xb6   : > { %1884 = vtanh.f32 %v774_v17  ;;  %v1879_v25 = vpop.eup %1878  ;;  %v785_v40 = vadd.f32 1.0, %v1877_v23  ;;  %v814_v17 = vld [vmem:[%s2650_s4 + $0x18] sm:$0xff]  ;;  %v2254_v23 = vld [vmem:[%s2653_s7 + $0x8] sm:$0xff] }
  0xb7   : > { %1886 = vtanh.f32 %v772_v22  ;;  %v786_v50 = vadd.f32 1.0, %v1879_v25  ;;  %832 = vperm.xlu2 %1859, %v814_v17   ;;  %v811_v25 = vld [vmem:[%s2650_s4] sm:$0xff] }
  0xb8   : > { %v661_v27 = vpop.permute.xlu1 %660  ;;  %v793_v57 = vmul.f32 0.5, %v785_v40  ;;  %v809_v40 = vld [vmem:[%s2649_s3 + $0x10] sm:$0xff] }
  0xb9   : > { %v681_v41 = vmul.f32 %v2154_v43, %v661_v27  ;;  %v682_v14 = vmul.f32 %v2156_v44, %v661_v27  ;;  %v794_v60 = vmul.f32 0.5, %v786_v50 }
  0xba   : > { %v1881_v13 = vpop.eup %1880 }
  0xbb   : > { %v1883_v30 = vpop.eup %1882  ;;  %v787_v33 = vadd.f32 1.0, %v1881_v13  ;;  %v689_v58 = vadd.f32 %v681_v41, %v651_v53  ;;  %v690_v59 = vadd.f32 %v682_v14, %v652_v36 }
  0xbc   : > { %v1885_v34 = vpop.eup %1884  ;;  %v789_v39 = vadd.f32 1.0, %v1883_v30 }
  0xbd   : > { %v1887_v28 = vpop.eup %1886  ;;  %v790_v29 = vadd.f32 1.0, %v1885_v34  ;;  %v795_v52 = vmul.f32 0.5, %v787_v33  ;;  %v807_v34 = vld [vmem:[%s2649_s3] sm:$0xff] }
  0xbe   : > { %v797_v51 = vmul.f32 0.5, %v789_v39  ;;  %v788_v35 = vadd.f32 1.0, %v1887_v28  ;;  %v808_v39 = vld [vmem:[%s2649_s3 + $0x8] sm:$0xff] }
  0xbf   : > { %v798_v54 = vmul.f32 0.5, %v790_v29  ;;  %817 = vperm.xlu2 %1859, %v811_v25  }
  0xc0   : > { %v805_v55 = vmul.f32 %v797_v51, %v733_v46  ;;  %v796_v56 = vmul.f32 0.5, %v788_v35  ;;  %v803_v46 = vmul.f32 %v795_v52, %v2193_v42 }
  0xc1   : > { %v699_v43 = vpop.permute.xlu1 %698  ;;  %v806_v44 = vmul.f32 %v798_v54, %v2197_v49  ;;  %v801_v49 = vmul.f32 %v793_v57, %v2176_v18  ;;  %v1088_v18 = vld [vmem:[%s2654_s8 + $0x18] sm:$0xff] }
  0xc2   : > { %v719_v61 = vmul.f32 %v2158_v47, %v699_v43  ;;  %v720_v62 = vmul.f32 %v2160_v48, %v699_v43  ;;  %860 = vmatpush.msra.mxu0 %v805_v55  ;;  %1805 = vmatpush.msra.mxu2 %v805_v55  ;;  %v804_v63 = vmul.f32 %v796_v56, %v2195_v45  ;;  %v813_v45 = vld [vmem:[%s2650_s4 + $0x10] sm:$0xff] }
  0xc3   : > { %889 = vmatpush.msra.mxu1 %v806_v44  ;;  %1809 = vmatpush.msra.mxu3 %v806_v44  ;;  %v802_v47 = vmul.f32 %v794_v60, %v2178_v19 }
  0xc4   : > { %v727_v0 = vadd.f32 %v719_v61, %v689_v58  ;;  %v728_v1 = vadd.f32 %v720_v62, %v690_v59  ;;  %861 = vmatpush.msra.mxu0 %v803_v46  ;;  %1806 = vmatpush.msra.mxu2 %v803_v46 }
  0xc5   : > { %890 = vmatpush.msra.mxu1 %v804_v63  ;;  %1810 = vmatpush.msra.mxu3 %v804_v63 }
  0xc6   : > { %862 = vmatpush.msra.mxu0 %v801_v49  ;;  %1807 = vmatpush.msra.mxu2 %v801_v49  ;;  %v735_v48 = vmul.f32 %v727_v0, %v727_v0  ;;  %v736_v2 = vmul.f32 %v728_v1, %v728_v1 }
  0xc7   : > { %891 = vmatpush.msra.mxu1 %v802_v47  ;;  %1811 = vmatpush.msra.mxu3 %v802_v47 }
  0xc8   : > { %v743_v42 = vmul.f32 %v735_v48, %v727_v0  ;;  %v744_v4 = vmul.f32 %v736_v2, %v728_v1  ;;  %827 = vperm.xlu0 %1860, %v813_v45   ;;  %1106 = vperm.xlu1 %1861, %v1088_v18  }
  0xc9   : > { %1067 = vperm.xlu2 %1859, %v1049_v38  }
  0xca   : > { %v751_v5 = vmul.f32 0.044715, %v743_v42  ;;  %v752_v19 = vmul.f32 0.044715, %v744_v4 }
  0xcc   : > { %v759_v7 = vadd.f32 %v751_v5, %v727_v0  ;;  %v760_v9 = vadd.f32 %v752_v19, %v728_v1 }
  0xce   : > { %v767_v10 = vmul.f32 0.7978846, %v759_v7  ;;  %v768_v12 = vmul.f32 0.7978846, %v760_v9  ;;  %v1085_v9 = vld [vmem:[%s2654_s8] sm:$0xff] }
  0xd0   : > { %1888 = vtanh.f32 %v767_v10  ;;  %1062 = vperm.xlu0 %1860, %v2242_v15   ;;  %1101 = vperm.xlu1 %1861, %v1087_v16   ;;  %v1086_v10 = vld [vmem:[%s2654_s8 + $0x8] sm:$0xff] }
  0xd1   : > { %1890 = vtanh.f32 %v768_v12  ;;  %1862 = vset.pattern.permute.xlu2 %v1973_v6 }
  0xd2   : > { %1130 = vperm.xlu2 %1862, %v1049_v38  }
  0xd6   : > { %v1889_v22 = vpop.eup %1888 }
  0xd7   : > { %v1891_v26 = vpop.eup %1890  ;;  %v783_v27 = vadd.f32 1.0, %v1889_v22 }
  0xd8   : > { %v784_v13 = vadd.f32 1.0, %v1891_v26  ;;  %1057 = vperm.xlu0 %1860, %v2254_v23   ;;  %1052 = vperm.xlu1 %1861, %v2259_v24  }
  0xd9   : > { %v791_v30 = vmul.f32 0.5, %v783_v27 }
  0xda   : > { %v792_v31 = vmul.f32 0.5, %v784_v13  ;;  %1126 = vperm.xlu2 %1862, %v2242_v15  }
  0xdb   : > { %v799_v32 = vmul.f32 %v791_v30, %v727_v0 }
  0xdc   : > { %v800_v33 = vmul.f32 %v792_v31, %v728_v1 }
  0xdd   : > { %863 = vmatpush.msra.mxu0 %v799_v32  ;;  %1808 = vmatpush.msra.mxu2 %v799_v32 }
  0xde   : > { %892 = vmatpush.msra.mxu1 %v800_v33  ;;  %1812 = vmatpush.msra.mxu3 %v800_v33 }
  0xdf   : > { %1774 = vmatmul.msk.f32.vlgmr.msra.gmra.mxu0 %vm835_vm0, %v807_v34  ;;  %1777 = vmatmul.msk.f32.vlgmr.msra.gmra.mxu2 %vm835_vm0, %v810_v37 }
  0xe0   : > { %1778 = vmatmul.msk.f32.vlgmr.msra.gmra.mxu1 %vm835_vm0, %v807_v34  ;;  %1781 = vmatmul.msk.f32.vlgmr.msra.gmra.mxu3 %vm835_vm0, %v810_v37 }
  0xe1   : > { %1864 = vset.pattern.permute.xlu1 %v1973_v6  ;;  %1866 = vset.pattern.permute.xlu0 %v1975_v11 }
  0xe2   : > { %1122 = vperm.xlu1 %1864, %v2254_v23   ;;  %1206 = vperm.xlu0 %1866, %v1049_v38  }
  0xe3   : > { %1863 = vset.pattern.permute.xlu2 %v1972_v3 }
  0xe4   : > { %1096 = vperm.xlu2 %1863, %v1086_v10   ;;  %v978_v10 = vld [vmem:[%s2651_s5] sm:$0xf] }
  0xe7   : > { %1775 = vmatmul.msk.f32.gmra.mxu0 %vm835_vm0, %v808_v39 }
  0xe8   : > { %1779 = vmatmul.msk.f32.gmra.mxu1 %vm835_vm0, %v808_v39 }
  0xea   : > { %1868 = vset.pattern.permute.xlu1 %v1972_v3  ;;  %1867 = vset.pattern.permute.xlu0 %v1974_v8 }
  0xeb   : > { %1168 = vperm.xlu0 %1867, %v1049_v38   ;;  %1091 = vperm.xlu1 %1868, %v1085_v9  }
  0xec   : > { %1865 = vset.pattern.permute.xlu2 %v1974_v8 }
  0xed   : > { %1164 = vperm.xlu2 %1865, %v2242_v15  }
  0xef   : > { %1776 = vmatmul.msk.f32.gmra.mxu0 %vm835_vm0, %v809_v40 }
  0xf0   : > { %1780 = vmatmul.msk.f32.gmra.mxu1 %vm835_vm0, %v809_v40 }
  0xf3   : > { %1156 = vperm.xlu0 %1867, %v2259_v24   ;;  %1870 = vset.pattern.permute.xlu1 %v1974_v8 }
  0xf4   : > { %1160 = vperm.xlu1 %1870, %v2254_v23  }
  0xf5   : > { %1869 = vset.pattern.permute.xlu2 %v1973_v6 }
  0xf6   : > { %1118 = vperm.xlu2 %1869, %v2259_v24  }
  0xfb   : > { %1875 = vset.pattern.permute.xlu0 %v1972_v3 }
  0xfc   : > { %1872 = vset.pattern.permute.xlu1 %v1975_v11 }
  0xfd   : > { %1198 = vperm.xlu1 %1872, %v2254_v23  }
  0xfe   : > { %1871 = vset.pattern.permute.xlu2 %v1975_v11 }
  0xff   : > { %1202 = vperm.xlu2 %1871, %v2242_v15  }
 0x105   : > { %1873 = vset.pattern.permute.xlu1 %v1972_v3 }
 0x107   : > { %1194 = vperm.xlu2 %1871, %v2259_v24  }
 0x10f   : > { %1874 = vset.pattern.permute.xlu2 %v1972_v3 }
 0x111   : > { %v833_v28 = vpop.permute.xlu2 %832 }
 0x112   : > { %v823_v54 = vpop.permute.xlu1 %822 }
 0x119   : > { %v818_v41 = vpop.permute.xlu2 %817 }
 0x11f   : > { %v983_v11 = vpop.permute.xlu1 %982 }
 0x13a   : > { %v828_v45 = vpop.permute.xlu0 %827 }
 0x15c   : > { %v865_v14 = vpop.f32.mrf.mxu0 }
 0x15d   : > { %v894_v29 = vpop.f32.mrf.mxu1  ;;  %v2299_v50 = vadd.f32 %v865_v14, %v818_v41 }
 0x15e   : > { %v2301_v51 = vadd.f32 %v894_v29, %v818_v41 }
 0x15f   : > { %v906_v35 = vmul.f32 %v2299_v50, %v2299_v50 }
 0x160   : > { %v907_v55 = vmul.f32 %v2301_v51, %v2301_v51 }
 0x161   : > { %v914_v60 = vmul.f32 %v906_v35, %v2299_v50 }
 0x162   : > { %v874_v52 = vpop.f32.mrf.mxu2  ;;  %v915_v46 = vmul.f32 %v907_v55, %v2301_v51 }
 0x163   : > { %v2305_v53 = vadd.f32 %v874_v52, %v833_v28  ;;  %v903_v36 = vpop.f32.mrf.mxu3  ;;  %v922_v4 = vmul.f32 0.044715, %v914_v60 }
 0x164   : > { %v2309_v56 = vadd.f32 %v903_v36, %v833_v28  ;;  %v868_v57 = vpop.f32.mrf.mxu0  ;;  %v923_v7 = vmul.f32 0.044715, %v915_v46 }
 0x165   : > { %v912_v20 = vmul.f32 %v2305_v53, %v2305_v53  ;;  %v2313_v58 = vadd.f32 %v868_v57, %v823_v54  ;;  %v897_v59 = vpop.f32.mrf.mxu1  ;;  %v930_v30 = vadd.f32 %v922_v4, %v2299_v50 }
 0x166   : > { %v913_v43 = vmul.f32 %v2309_v56, %v2309_v56  ;;  %v2317_v44 = vadd.f32 %v897_v59, %v823_v54  ;;  %v931_v32 = vadd.f32 %v923_v7, %v2301_v51 }
 0x167   : > { %v920_v61 = vmul.f32 %v912_v20, %v2305_v53  ;;  %v908_v62 = vmul.f32 %v2313_v58, %v2313_v58  ;;  %v938_v40 = vmul.f32 0.7978846, %v930_v30 }
 0x168   : > { %v921_v63 = vmul.f32 %v913_v43, %v2309_v56  ;;  %v909_v0 = vmul.f32 %v2317_v44, %v2317_v44  ;;  %v939_v41 = vmul.f32 0.7978846, %v931_v32 }
 0x169   : > { %v916_v1 = vmul.f32 %v908_v62, %v2313_v58  ;;  %v928_v49 = vmul.f32 0.044715, %v920_v61 }
 0x16a   : > { %v917_v47 = vmul.f32 %v909_v0, %v2317_v44  ;;  %v929_v48 = vmul.f32 0.044715, %v921_v63 }
 0x16b   : > { %v936_v2 = vadd.f32 %v928_v49, %v2305_v53  ;;  %v924_v42 = vmul.f32 0.044715, %v916_v1 }
 0x16c   : > { %v871_v18 = vpop.f32.mrf.mxu0  ;;  %v937_v5 = vadd.f32 %v929_v48, %v2309_v56  ;;  %v925_v19 = vmul.f32 0.044715, %v917_v47 }
 0x16d   : > { %v2337_v12 = vadd.f32 %v871_v18, %v828_v45  ;;  %v900_v16 = vpop.f32.mrf.mxu1  ;;  %v944_v17 = vmul.f32 0.7978846, %v936_v2  ;;  %v932_v22 = vadd.f32 %v924_v42, %v2313_v58 }
 0x16e   : > { %v2340_v26 = vadd.f32 %v900_v16, %v828_v45  ;;  %v945_v27 = vmul.f32 0.7978846, %v937_v5  ;;  %v933_v25 = vadd.f32 %v925_v19, %v2317_v44 }
 0x16f   : > { %v910_v13 = vmul.f32 %v2337_v12, %v2337_v12  ;;  %1892 = vtanh.f32 %v944_v17  ;;  %v940_v34 = vmul.f32 0.7978846, %v932_v22 }
 0x170   : > { %v911_v31 = vmul.f32 %v2340_v26, %v2340_v26  ;;  %1894 = vtanh.f32 %v945_v27  ;;  %v941_v38 = vmul.f32 0.7978846, %v933_v25  ;;  %v1063_v27 = vpop.permute.xlu0 %1062 }
 0x171   : > { %v918_v33 = vmul.f32 %v910_v13, %v2337_v12  ;;  %1896 = vtanh.f32 %v940_v34 }
 0x172   : > { %v919_v37 = vmul.f32 %v911_v31, %v2340_v26  ;;  %1898 = vtanh.f32 %v941_v38 }
 0x173   : > { %v926_v39 = vmul.f32 0.044715, %v918_v33  ;;  %1900 = vtanh.f32 %v938_v40 }
 0x174   : > { %v927_v28 = vmul.f32 0.044715, %v919_v37  ;;  %1902 = vtanh.f32 %v939_v41 }
 0x175   : > { %v1893_v14 = vpop.eup %1892  ;;  %v934_v29 = vadd.f32 %v926_v39, %v2337_v12 }
 0x176   : > { %v1895_v52 = vpop.eup %1894  ;;  %v960_v35 = vadd.f32 1.0, %v1893_v14  ;;  %v935_v36 = vadd.f32 %v927_v28, %v2340_v26 }
 0x177   : > { %v961_v54 = vadd.f32 1.0, %v1895_v52  ;;  %v942_v55 = vmul.f32 0.7978846, %v934_v29  ;;  %v1897_v8 = vpop.eup %1896 }
 0x178   : > { %v968_v57 = vmul.f32 0.5, %v960_v35  ;;  %v943_v20 = vmul.f32 0.7978846, %v935_v36  ;;  %v1899_v61 = vpop.eup %1898  ;;  %v956_v63 = vadd.f32 1.0, %v1897_v8  ;;  %v1058_v33 = vpop.permute.xlu0 %1057 }
 0x179   : > { %v969_v59 = vmul.f32 0.5, %v961_v54  ;;  %1904 = vtanh.f32 %v942_v55  ;;  %v1901_v62 = vpop.eup %1900  ;;  %v957_v1 = vadd.f32 1.0, %v1899_v61 }
 0x17a   : > { %v976_v43 = vmul.f32 %v968_v57, %v2305_v53  ;;  %1906 = vtanh.f32 %v943_v20  ;;  %v1903_v46 = vpop.eup %1902  ;;  %v954_v47 = vadd.f32 1.0, %v1901_v62  ;;  %v964_v42 = vmul.f32 0.5, %v956_v63 }
 0x17b   : > { %v977_v60 = vmul.f32 %v969_v59, %v2309_v56  ;;  %v955_v48 = vadd.f32 1.0, %v1903_v46  ;;  %v965_v45 = vmul.f32 0.5, %v957_v1 }
 0x17c   : > { %1000 = vmatpush.msrb.mxu2 %v976_v43  ;;  %v962_v5 = vmul.f32 0.5, %v954_v47  ;;  %v972_v23 = vmul.f32 %v964_v42, %v2313_v58  ;;  %v2381_v58 = vpop.permute.xlu1 %1106 }
 0x17d   : > { %1020 = vmatpush.msrb.mxu3 %v977_v60  ;;  %v963_v19 = vmul.f32 0.5, %v955_v48  ;;  %v973_v7 = vmul.f32 %v965_v45, %v2317_v44 }
 0x17e   : > { %v970_v9 = vmul.f32 %v962_v5, %v2299_v50  ;;  %v2379_v50 = vpop.permute.xlu2 %1067 }
 0x17f   : > { %v1905_v0 = vpop.eup %1904 }
 0x180   : > { %v1907_v53 = vpop.eup %1906  ;;  %v958_v49 = vadd.f32 1.0, %v1905_v0  ;;  %v1207_v28 = vpop.permute.xlu0 %1206 }
 0x181   : > { %v959_v56 = vadd.f32 1.0, %v1907_v53 }
 0x182   : > { %v966_v2 = vmul.f32 0.5, %v958_v49 }
 0x183   : > { %v967_v4 = vmul.f32 0.5, %v959_v56 }
 0x184   : > { %v974_v18 = vmul.f32 %v966_v2, %v2337_v12  ;;  %v971_v12 = vmul.f32 %v963_v19, %v2301_v51  ;;  %v2385_v51 = vpop.permute.xlu1 %1101 }
 0x185   : > { %v975_v6 = vmul.f32 %v967_v4, %v2340_v26 }
 0x186   : > { %1001 = vmatpush.msrb.mxu2 %v974_v18  ;;  %v2383_v15 = vpop.permute.xlu2 %1130 }
 0x187   : > { %1021 = vmatpush.msrb.mxu3 %v975_v6 }
 0x188   : > { %1002 = vmatpush.msrb.mxu2 %v972_v23  ;;  %v1169_v1 = vpop.permute.xlu0 %1168 }
 0x189   : > { %1022 = vmatpush.msrb.mxu3 %v973_v7 }
 0x18a   : > { %1003 = vmatpush.msrb.mxu2 %v970_v9 }
 0x18b   : > { %1023 = vmatpush.msrb.mxu3 %v971_v12  ;;  %1782 = vmatmul.msk.f32.vlgmr.msrb.gmra.mxu2 %vm835_vm0, %v978_v10 }
 0x18c   : > { %1783 = vmatmul.msk.f32.vlgmr.msrb.gmra.mxu3 %vm835_vm0, %v978_v10  ;;  %v2387_v24 = vpop.permute.xlu1 %1052 }
 0x18e   : > { %v1127_v44 = vpop.permute.xlu2 %1126 }
 0x194   : > { %v1123_v34 = vpop.permute.xlu1 %1122 }
 0x196   : > { %v1097_v3 = vpop.permute.xlu2 %1096 }
 0x19c   : > { %v1092_v14 = vpop.permute.xlu1 %1091 }
 0x19e   : > { %v1165_v40 = vpop.permute.xlu2 %1164 }
 0x1a4   : > { %v1161_v4 = vpop.permute.xlu1 %1160 }
 0x1a6   : > { %v1119_v35 = vpop.permute.xlu2 %1118 }
 0x1ae   : > { %v1203_v10 = vpop.permute.xlu2 %1202 }
 0x20e   : > { %v1005_v16 = vpop.f32.mrf.mxu2 }
 0x20f   : > { %v1006_v17 = vadd.f32 %v1005_v16, %v983_v11  ;;  %v1025_v22 = vpop.f32.mrf.mxu3 }
 0x210   : > { %v1026_v26 = vadd.f32 %v1025_v22, %v983_v11 }
 0x211   : > { %v1028_v25 = vsub.f32 0.0, %v1006_v17 }
 0x212   : > { %v1029_v13 = vsub.f32 0.0, %v1026_v26 }
 0x213   : > { %v1030_v30 = vmul.f32 1.442695, %v1028_v25 }
 0x214   : > { %v1032_v31 = vmul.f32 1.442695, %v1029_v13 }
 0x215   : > { %1908 = vpow2.f32 %v1030_v30 }
 0x216   : > { %1910 = vpow2.f32 %v1032_v31 }
 0x21b   : > { %v1909_v32 = vpop.eup %1908 }
 0x21c   : > { %v1911_v37 = vpop.eup %1910  ;;  %v1034_v38 = vadd.f32 1.0, %v1909_v32 }
 0x21d   : > { %v1035_v39 = vadd.f32 1.0, %v1911_v37 }
 0x21f   : > { %1912 = vrcp.f32 %v1035_v39 }
 0x220   : > { %1914 = vrcp.f32 %v1034_v38 }
 0x225   : > { %v1913_v41 = vpop.eup %1912 }
 0x226   : > { %v1040_v29 = vrot.slane %v1913_v41, 4  ;;  %v1915_v52 = vpop.eup %1914 }
 0x228   : > { %v1042_v36 = vsel %vm1041_vm1, %v1915_v52, %v1040_v29  ;;  %v1157_v29 = vpop.permute.xlu0 %1156 }
 0x229   : > { %1044 = vst [vmem:[%s537_s18] sm:$0xff] %v1042_v36  ;;  %v1045_v54 = vmul.f32 %v1042_v36, %v2130_v21  ;;  %s2607_s18 = scalar_lea.vmem %s2660_s14, %s1804_s27 }
 0x22b   : > { %v1071_v55 = vperm.slane %v1045_v54, 0  ;;  %v1072_v57 = vperm.slane %v1045_v54, 4  ;;  %v1133_v20 = vperm.slane %v1045_v54, 1  ;;  %v1134_v59 = vperm.slane %v1045_v54, 5 }
 0x22c   : > { %v1171_v43 = vperm.slane %v1045_v54, 2  ;;  %v1172_v8 = vperm.slane %v1045_v54, 6  ;;  %v1209_v60 = vperm.slane %v1045_v54, 3  ;;  %v1210_v61 = vperm.slane %v1045_v54, 7 }
 0x22d   : > { %v1075_v62 = vperm.slane %v1071_v55, 0  ;;  %v1076_v46 = vperm.slane %v1072_v57, 0  ;;  %v1137_v63 = vperm.slane %v1133_v20, 1  ;;  %v1138_v0 = vperm.slane %v1134_v59, 1  ;;  %v1199_v20 = vpop.permute.xlu1 %1198 }
 0x22e   : > { %v1175_v53 = vperm.slane %v1171_v43, 2  ;;  %v1176_v49 = vperm.slane %v1172_v8, 2  ;;  %v2395_v47 = vperm.slane %v1209_v60, 3  ;;  %v2397_v56 = vperm.slane %v1210_v61, 3 }
 0x22f   : > { %v1079_v21 = vmul.f32 %v1075_v62, %v1058_v33  ;;  %v1080_v48 = vmul.f32 %v1076_v46, %v1058_v33  ;;  %v1141_v2 = vmul.f32 %v1137_v63, %v1123_v34  ;;  %v1142_v42 = vmul.f32 %v1138_v0, %v1123_v34 }
 0x230   : > { %v1081_v45 = vmul.f32 %v1075_v62, %v1063_v27  ;;  %v1082_v18 = vmul.f32 %v1076_v46, %v1063_v27  ;;  %v1143_v5 = vmul.f32 %v1137_v63, %v1127_v44  ;;  %v1144_v6 = vmul.f32 %v1138_v0, %v1127_v44 }
 0x231   : > { %v1111_v19 = vadd.f32 %v1097_v3, %v1079_v21  ;;  %v1112_v23 = vadd.f32 %v1097_v3, %v1080_v48  ;;  %v1181_v7 = vmul.f32 %v1175_v53, %v1165_v40  ;;  %v1182_v9 = vmul.f32 %v1176_v49, %v1165_v40 }
 0x232   : > { %v1113_v12 = vadd.f32 %v2385_v51, %v1081_v45  ;;  %v1114_v11 = vadd.f32 %v2385_v51, %v1082_v18  ;;  %v1221_v16 = vmul.f32 %v2395_v47, %v1207_v28  ;;  %v1222_v17 = vmul.f32 %v2397_v56, %v1207_v28 }
 0x233   : > { %v1149_v22 = vadd.f32 %v1141_v2, %v1111_v19  ;;  %v1150_v26 = vadd.f32 %v1142_v42, %v1112_v23  ;;  %v1077_v25 = vmul.f32 %v1075_v62, %v2387_v24  ;;  %v1078_v27 = vmul.f32 %v1076_v46, %v2387_v24 }
 0x234   : > { %v1151_v44 = vadd.f32 %v1143_v5, %v1113_v12  ;;  %v1152_v13 = vadd.f32 %v1144_v6, %v1114_v11  ;;  %v1139_v3 = vmul.f32 %v1137_v63, %v1119_v35  ;;  %v1140_v30 = vmul.f32 %v1138_v0, %v1119_v35 }
 0x235   : > { %v1109_v31 = vadd.f32 %v1092_v14, %v1077_v25  ;;  %v1110_v32 = vadd.f32 %v1092_v14, %v1078_v27  ;;  %v1083_v33 = vmul.f32 %v1075_v62, %v2379_v50  ;;  %v1084_v51 = vmul.f32 %v1076_v46, %v2379_v50  ;;  %v1195_v46 = vpop.permute.xlu2 %1194 }
 0x236   : > { %v1189_v34 = vadd.f32 %v1181_v7, %v1151_v44  ;;  %v1190_v37 = vadd.f32 %v1182_v9, %v1152_v13  ;;  %v1145_v38 = vmul.f32 %v1137_v63, %v2383_v15  ;;  %v1146_v39 = vmul.f32 %v1138_v0, %v2383_v15 }
 0x237   : > { %v1147_v40 = vadd.f32 %v1139_v3, %v1109_v31  ;;  %v1148_v28 = vadd.f32 %v1140_v30, %v1110_v32  ;;  %v1115_v24 = vadd.f32 %v2381_v58, %v1083_v33  ;;  %v1116_v41 = vadd.f32 %v2381_v58, %v1084_v51 }
 0x238   : > { %v1183_v52 = vmul.f32 %v1175_v53, %v1169_v1  ;;  %v1184_v35 = vmul.f32 %v1176_v49, %v1169_v1  ;;  %v1179_v14 = vmul.f32 %v1175_v53, %v1161_v4  ;;  %v1180_v36 = vmul.f32 %v1176_v49, %v1161_v4 }
 0x239   : > { %v1153_v54 = vadd.f32 %v1145_v38, %v1115_v24  ;;  %v1154_v55 = vadd.f32 %v1146_v39, %v1116_v41  ;;  %v1219_v50 = vmul.f32 %v2395_v47, %v1203_v10  ;;  %v1220_v57 = vmul.f32 %v2397_v56, %v1203_v10  ;;  %v1310_v41 = vld [vmem:[%s2656_s10 + $0x18] sm:$0xff] }
 0x23a   : > { %v1187_v59 = vadd.f32 %v1179_v14, %v1149_v22  ;;  %v1188_v15 = vadd.f32 %v1180_v36, %v1150_v26  ;;  %v1177_v43 = vmul.f32 %v1175_v53, %v1157_v29  ;;  %v1178_v8 = vmul.f32 %v1176_v49, %v1157_v29  ;;  %1328 = vperm.xlu1 %1873, %v1310_v41  }
 0x23b   : > { %v1191_v60 = vadd.f32 %v1183_v52, %v1153_v54  ;;  %v1192_v61 = vadd.f32 %v1184_v35, %v1154_v55  ;;  %v2413_v62 = vadd.f32 %v1219_v50, %v1189_v34  ;;  %v2415_v58 = vadd.f32 %v1220_v57, %v1190_v37 }
 0x23c   : > { %v1185_v63 = vadd.f32 %v1177_v43, %v1147_v40  ;;  %v1186_v0 = vadd.f32 %v1178_v8, %v1148_v28  ;;  %v1217_v1 = vmul.f32 %v2395_v47, %v1199_v20  ;;  %v1218_v21 = vmul.f32 %v2397_v56, %v1199_v20 }
 0x23d   : > { %v2419_v48 = vadd.f32 %v1221_v16, %v1191_v60  ;;  %v2421_v2 = vadd.f32 %v1222_v17, %v1192_v61  ;;  %v1235_v53 = vmul.f32 %v2413_v62, %v2413_v62  ;;  %v1236_v49 = vmul.f32 %v2415_v58, %v2415_v58 }
 0x23e   : > { %v2427_v42 = vadd.f32 %v1217_v1, %v1187_v59  ;;  %v2429_v4 = vadd.f32 %v1218_v21, %v1188_v15  ;;  %v1215_v45 = vmul.f32 %v2395_v47, %v1195_v46  ;;  %v1216_v18 = vmul.f32 %v2397_v56, %v1195_v46  ;;  %v1307_v15 = vld [vmem:[%s2656_s10] sm:$0xff] }
 0x23f   : > { %v1237_v5 = vmul.f32 %v2419_v48, %v2419_v48  ;;  %v1238_v6 = vmul.f32 %v2421_v2, %v2421_v2  ;;  %v1243_v19 = vmul.f32 %v1235_v53, %v2413_v62  ;;  %v1244_v23 = vmul.f32 %v1236_v49, %v2415_v58 }
 0x240   : > { %v1233_v7 = vmul.f32 %v2427_v42, %v2427_v42  ;;  %v1234_v9 = vmul.f32 %v2429_v4, %v2429_v4  ;;  %v2443_v10 = vadd.f32 %v1215_v45, %v1185_v63  ;;  %v2445_v47 = vadd.f32 %v1216_v18, %v1186_v0 }
 0x241   : > { %v1245_v56 = vmul.f32 %v1237_v5, %v2419_v48  ;;  %v1246_v12 = vmul.f32 %v1238_v6, %v2421_v2  ;;  %v1251_v11 = vmul.f32 0.044715, %v1243_v19  ;;  %v1252_v16 = vmul.f32 0.044715, %v1244_v23 }
 0x242   : > { %v1231_v17 = vmul.f32 %v2443_v10, %v2443_v10  ;;  %v1232_v22 = vmul.f32 %v2445_v47, %v2445_v47  ;;  %v1241_v26 = vmul.f32 %v1233_v7, %v2427_v42  ;;  %v1242_v25 = vmul.f32 %v1234_v9, %v2429_v4  ;;  %1313 = vperm.xlu1 %1873, %v1307_v15  }
 0x243   : > { %v1253_v27 = vmul.f32 0.044715, %v1245_v56  ;;  %v1254_v44 = vmul.f32 0.044715, %v1246_v12  ;;  %v1259_v13 = vadd.f32 %v1251_v11, %v2413_v62  ;;  %v1260_v3 = vadd.f32 %v1252_v16, %v2415_v58 }
 0x244   : > { %v1249_v30 = vmul.f32 0.044715, %v1241_v26  ;;  %v1250_v31 = vmul.f32 0.044715, %v1242_v25  ;;  %v1239_v32 = vmul.f32 %v1231_v17, %v2443_v10  ;;  %v1240_v33 = vmul.f32 %v1232_v22, %v2445_v47  ;;  %v1308_v17 = vld [vmem:[%s2656_s10 + $0x8] sm:$0xff] }
 0x245   : > { %v1261_v51 = vadd.f32 %v1253_v27, %v2419_v48  ;;  %v1262_v34 = vadd.f32 %v1254_v44, %v2421_v2  ;;  %v1267_v37 = vmul.f32 0.7978846, %v1259_v13  ;;  %v1268_v38 = vmul.f32 0.7978846, %v1260_v3  ;;  %1318 = vperm.xlu0 %1875, %v1308_v17   ;;  %v1303_v27 = vld [vmem:[%s2655_s9] sm:$0xff]  ;;  %v1479_v44 = vld [vmem:[%s2658_s12 + $0x10] sm:$0xff] }
 0x246   : > { %v1257_v39 = vadd.f32 %v1249_v30, %v2427_v42  ;;  %v1258_v40 = vadd.f32 %v1250_v31, %v2429_v4  ;;  %v1247_v28 = vmul.f32 0.044715, %v1239_v32  ;;  %v1248_v24 = vmul.f32 0.044715, %v1240_v33  ;;  %v1305_v13 = vld [vmem:[%s2655_s9 + $0x10] sm:$0xff]  ;;  %v1306_v3 = vld [vmem:[%s2655_s9 + $0x18] sm:$0xff] }
 0x247   : > { %v1269_v29 = vmul.f32 0.7978846, %v1261_v51  ;;  %v1270_v52 = vmul.f32 0.7978846, %v1262_v34  ;;  %1916 = vtanh.f32 %v1267_v37 }
 0x248   : > { %1918 = vtanh.f32 %v1268_v38  ;;  %v1265_v35 = vmul.f32 0.7978846, %v1257_v39  ;;  %v1266_v14 = vmul.f32 0.7978846, %v1258_v40  ;;  %v1255_v36 = vadd.f32 %v1247_v28, %v2443_v10 }
 0x249   : > { %1920 = vtanh.f32 %v1269_v29  ;;  %v1256_v54 = vadd.f32 %v1248_v24, %v2445_v47 }
 0x24a   : > { %1922 = vtanh.f32 %v1270_v52  ;;  %v1263_v55 = vmul.f32 0.7978846, %v1255_v36 }
 0x24b   : > { %1924 = vtanh.f32 %v1265_v35  ;;  %v1264_v50 = vmul.f32 0.7978846, %v1256_v54 }
 0x24c   : > { %1926 = vtanh.f32 %v1266_v14 }
 0x24d   : > { %v1917_v57 = vpop.eup %1916  ;;  %1928 = vtanh.f32 %v1263_v55 }
 0x24e   : > { %v1919_v20 = vpop.eup %1918  ;;  %v1283_v59 = vadd.f32 1.0, %v1917_v57  ;;  %1930 = vtanh.f32 %v1264_v50 }
 0x24f   : > { %v1921_v43 = vpop.eup %1920  ;;  %v1284_v8 = vadd.f32 1.0, %v1919_v20 }
 0x250   : > { %v1923_v60 = vpop.eup %1922  ;;  %v1285_v61 = vadd.f32 1.0, %v1921_v43  ;;  %v1291_v21 = vmul.f32 0.5, %v1283_v59 }
 0x251   : > { %v1925_v46 = vpop.eup %1924  ;;  %v1286_v63 = vadd.f32 1.0, %v1923_v60  ;;  %v1292_v18 = vmul.f32 0.5, %v1284_v8 }
 0x252   : > { %v1927_v0 = vpop.eup %1926  ;;  %v1293_v1 = vmul.f32 0.5, %v1285_v61  ;;  %v1281_v53 = vadd.f32 1.0, %v1925_v46  ;;  %v2479_v11 = vmul.f32 %v1291_v21, %v2413_v62  ;;  %v1309_v62 = vld [vmem:[%s2656_s10 + $0x10] sm:$0xff] }
 0x253   : > { %v1929_v49 = vpop.eup %1928  ;;  %v1294_v45 = vmul.f32 0.5, %v1286_v63  ;;  %v1282_v5 = vadd.f32 1.0, %v1927_v0  ;;  %1323 = vperm.xlu2 %1874, %v1309_v62  }
 0x254   : > { %v1931_v6 = vpop.eup %1930  ;;  %v2472_v19 = vmul.f32 %v1293_v1, %v2419_v48  ;;  %v1289_v23 = vmul.f32 0.5, %v1281_v53  ;;  %v1279_v7 = vadd.f32 1.0, %v1929_v49  ;;  %v1478_v48 = vld [vmem:[%s2658_s12 + $0x8] sm:$0xff] }
 0x255   : > { %v2475_v9 = vmul.f32 %v1294_v45, %v2421_v2  ;;  %v1290_v56 = vmul.f32 0.5, %v1282_v5  ;;  %v1280_v12 = vadd.f32 1.0, %v1931_v6  ;;  %v2489_v2 = vmul.f32 %v1292_v18, %v2415_v58  ;;  %1488 = vperm.xlu1 %1873, %v1478_v48  }
 0x256   : > { %1355 = vmatpush.msra.mxu2 %v2472_v19  ;;  %v1287_v16 = vmul.f32 0.5, %v1279_v7  ;;  %v2496_v26 = vmul.f32 %v1289_v23, %v2427_v42 }
 0x257   : > { %1384 = vmatpush.msra.mxu3 %v2475_v9  ;;  %v1288_v22 = vmul.f32 0.5, %v1280_v12  ;;  %v2500_v25 = vmul.f32 %v1290_v56, %v2429_v4  ;;  %v1480_v4 = vld [vmem:[%s2658_s12 + $0x18] sm:$0xff] }
 0x258   : > { %1356 = vmatpush.msra.mxu2 %v2479_v11  ;;  %v2504_v58 = vmul.f32 %v1287_v16, %v2443_v10  ;;  %v1477_v10 = vld [vmem:[%s2658_s12] sm:$0xff]  ;;  %1498 = vperm.xlu0 %1875, %v1480_v4  }
 0x259   : > { %1385 = vmatpush.msra.mxu3 %v2489_v2  ;;  %v2511_v42 = vmul.f32 %v1288_v22, %v2445_v47  ;;  %v1304_v47 = vld [vmem:[%s2655_s9 + $0x8] sm:$0xff] }
 0x25a   : > { %1357 = vmatpush.msra.mxu2 %v2496_v26 }
 0x25b   : > { %1386 = vmatpush.msra.mxu3 %v2500_v25  ;;  %1483 = vperm.xlu2 %1874, %v1477_v10  }
 0x25c   : > { %1358 = vmatpush.msra.mxu2 %v2504_v58 }
 0x25d   : > { %1387 = vmatpush.msra.mxu3 %v2511_v42  ;;  %1784 = vmatmul.msk.f32.vlgmr.msra.gmra.mxu2 %vm835_vm0, %v1303_v27 }
 0x25e   : > { %1788 = vmatmul.msk.f32.vlgmr.msra.gmra.mxu3 %vm835_vm0, %v1303_v27 }
 0x263   : > { %1493 = vperm.xlu2 %1874, %v1479_v44  }
 0x265   : > { %1785 = vmatmul.msk.f32.gmra.mxu2 %vm835_vm0, %v1304_v47 }
 0x266   : > { %1789 = vmatmul.msk.f32.gmra.mxu3 %vm835_vm0, %v1304_v47 }
 0x26d   : > { %1786 = vmatmul.msk.f32.gmra.mxu2 %vm835_vm0, %v1305_v13 }
 0x26e   : > { %1790 = vmatmul.msk.f32.gmra.mxu3 %vm835_vm0, %v1305_v13 }
 0x275   : > { %1787 = vmatmul.msk.f32.gmra.mxu2 %vm835_vm0, %v1306_v3 }
 0x276   : > { %1791 = vmatmul.msk.f32.gmra.mxu3 %vm835_vm0, %v1306_v3 }
 0x2ac   : > { %v1329_v30 = vpop.permute.xlu1 %1328 }
 0x2ad   : > { %v1324_v36 = vpop.permute.xlu2 %1323 }
 0x2b4   : > { %v1314_v33 = vpop.permute.xlu1 %1313 }
 0x2b7   : > { %v1319_v37 = vpop.permute.xlu0 %1318 }
 0x2e0   : > { %v1360_v31 = vpop.f32.mrf.mxu2 }
 0x2e1   : > { %v1389_v32 = vpop.f32.mrf.mxu3  ;;  %v2541_v51 = vadd.f32 %v1360_v31, %v1314_v33 }
 0x2e2   : > { %v2543_v34 = vadd.f32 %v1389_v32, %v1314_v33 }
 0x2e3   : > { %v1401_v40 = vmul.f32 %v2541_v51, %v2541_v51 }
 0x2e4   : > { %v1402_v24 = vmul.f32 %v2543_v34, %v2543_v34 }
 0x2e5   : > { %v1409_v29 = vmul.f32 %v1401_v40, %v2541_v51 }
 0x2e6   : > { %v1410_v35 = vmul.f32 %v1402_v24, %v2543_v34 }
 0x2e7   : > { %v1417_v15 = vmul.f32 0.044715, %v1409_v29 }
 0x2e8   : > { %v1363_v38 = vpop.f32.mrf.mxu2  ;;  %v1418_v60 = vmul.f32 0.044715, %v1410_v35 }
 0x2e9   : > { %v1392_v39 = vpop.f32.mrf.mxu3  ;;  %v2547_v28 = vadd.f32 %v1363_v38, %v1319_v37  ;;  %v1425_v1 = vadd.f32 %v1417_v15, %v2541_v51 }
 0x2ea   : > { %v2551_v41 = vadd.f32 %v1392_v39, %v1319_v37  ;;  %v1426_v45 = vadd.f32 %v1418_v60, %v2543_v34 }
 0x2eb   : > { %v1403_v52 = vmul.f32 %v2547_v28, %v2547_v28  ;;  %v1433_v16 = vmul.f32 0.7978846, %v1425_v1 }
 0x2ec   : > { %v1404_v14 = vmul.f32 %v2551_v41, %v2551_v41  ;;  %v1434_v22 = vmul.f32 0.7978846, %v1426_v45 }
 0x2ed   : > { %v1411_v20 = vmul.f32 %v1403_v52, %v2547_v28  ;;  %1932 = vtanh.f32 %v1433_v16  ;;  %v1976_v16 = vmov 0.0  }
 0x2ee   : > { %v1412_v43 = vmul.f32 %v1404_v14, %v2551_v41  ;;  %1934 = vtanh.f32 %v1434_v22  ;;  %1600 = vst.msk [vmem:[%s2607_s18] sm:$0xff] %vm1599_vm2, %v1976_v16 }
 0x2ef   : > { %v1419_v0 = vmul.f32 0.044715, %v1411_v20  ;;  %1601 = vst.msk [vmem:[%s2607_s18 + $0x8] sm:$0xff] %vm1599_vm2, %v1976_v16 }
 0x2f0   : > { %v1366_v54 = vpop.f32.mrf.mxu2  ;;  %v1420_v49 = vmul.f32 0.044715, %v1412_v43  ;;  %1602 = vst.msk [vmem:[%s2607_s18 + $0x10] sm:$0xff] %vm1599_vm2, %v1976_v16 }
 0x2f1   : > { %v2559_v55 = vadd.f32 %v1366_v54, %v1324_v36  ;;  %v1395_v50 = vpop.f32.mrf.mxu3  ;;  %v1427_v12 = vadd.f32 %v1419_v0, %v2547_v28  ;;  %1603 = vst.msk [vmem:[%s2607_s18 + $0x18] sm:$0xff] %vm1599_vm2, %v1976_v16 }
 0x2f2   : > { %v2561_v57 = vadd.f32 %v1395_v50, %v1324_v36  ;;  %v1428_v48 = vadd.f32 %v1420_v49, %v2551_v41 }
 0x2f3   : > { %v1405_v59 = vmul.f32 %v2559_v55, %v2559_v55  ;;  %v1435_v44 = vmul.f32 0.7978846, %v1427_v12  ;;  %v1933_v37 = vpop.eup %1932 }
 0x2f4   : > { %v1406_v8 = vmul.f32 %v2561_v57, %v2561_v57  ;;  %v1436_v3 = vmul.f32 0.7978846, %v1428_v48  ;;  %v1935_v38 = vpop.eup %1934 }
 0x2f5   : > { %v1413_v61 = vmul.f32 %v1405_v59, %v2559_v55 }
 0x2f6   : > { %v1414_v46 = vmul.f32 %v1406_v8, %v2561_v57  ;;  %v1449_v8 = vadd.f32 1.0, %v1933_v37 }
 0x2f7   : > { %v1421_v63 = vmul.f32 0.044715, %v1413_v61 }
 0x2f8   : > { %v1369_v21 = vpop.f32.mrf.mxu2  ;;  %v1422_v53 = vmul.f32 0.044715, %v1414_v46  ;;  %v1450_v46 = vadd.f32 1.0, %v1935_v38  ;;  %v1457_v49 = vmul.f32 0.5, %v1449_v8 }
 0x2f9   : > { %v1370_v18 = vadd.f32 %v1369_v21, %v1329_v30  ;;  %v1398_v5 = vpop.f32.mrf.mxu3  ;;  %v1429_v6 = vadd.f32 %v1421_v63, %v2559_v55 }
 0x2fa   : > { %v1399_v23 = vadd.f32 %v1398_v5, %v1329_v30  ;;  %v1430_v7 = vadd.f32 %v1422_v53, %v2561_v57  ;;  %v1458_v5 = vmul.f32 0.5, %v1450_v46 }
 0x2fb   : > { %v1407_v56 = vmul.f32 %v1370_v18, %v1370_v18  ;;  %v1437_v27 = vmul.f32 0.7978846, %v1429_v6 }
 0x2fc   : > { %v1408_v17 = vmul.f32 %v1399_v23, %v1399_v23  ;;  %v1438_v10 = vmul.f32 0.7978846, %v1430_v7 }
 0x2fd   : > { %v1415_v62 = vmul.f32 %v1407_v56, %v1370_v18  ;;  %1936 = vtanh.f32 %v1437_v27  ;;  %v1489_v27 = vpop.permute.xlu1 %1488 }
 0x2fe   : > { %v1416_v4 = vmul.f32 %v1408_v17, %v1399_v23  ;;  %1938 = vtanh.f32 %v1438_v10 }
 0x2ff   : > { %v1423_v47 = vmul.f32 0.044715, %v1415_v62  ;;  %1940 = vtanh.f32 %v1435_v44 }
 0x300   : > { %v1424_v13 = vmul.f32 0.044715, %v1416_v4  ;;  %1942 = vtanh.f32 %v1436_v3 }
 0x301   : > { %v1431_v30 = vadd.f32 %v1423_v47, %v1370_v18 }
 0x302   : > { %v1432_v31 = vadd.f32 %v1424_v13, %v1399_v23 }
 0x303   : > { %v1439_v32 = vmul.f32 0.7978846, %v1431_v30  ;;  %v1937_v39 = vpop.eup %1936 }
 0x304   : > { %v1440_v33 = vmul.f32 0.7978846, %v1432_v31  ;;  %v1939_v40 = vpop.eup %1938  ;;  %v1453_v52 = vadd.f32 1.0, %v1937_v39 }
 0x305   : > { %1944 = vtanh.f32 %v1439_v32  ;;  %v1941_v24 = vpop.eup %1940  ;;  %v1454_v14 = vadd.f32 1.0, %v1939_v40  ;;  %v1499_v40 = vpop.permute.xlu0 %1498 }
 0x306   : > { %1946 = vtanh.f32 %v1440_v33  ;;  %v1943_v29 = vpop.eup %1942  ;;  %v1451_v50 = vadd.f32 1.0, %v1941_v24  ;;  %v1461_v43 = vmul.f32 0.5, %v1453_v52 }
 0x307   : > { %v1452_v59 = vadd.f32 1.0, %v1943_v29  ;;  %v1462_v61 = vmul.f32 0.5, %v1454_v14 }
 0x308   : > { %v1459_v0 = vmul.f32 0.5, %v1451_v50  ;;  %v1469_v53 = vmul.f32 %v1461_v43, %v2559_v55  ;;  %v1466_v55 = vmul.f32 %v1458_v5, %v2543_v34  ;;  %v1476_v34 = vld [vmem:[%s2657_s11 + $0x18] sm:$0xff]  ;;  %v1605_v50 = vld [vmem:[%s2607_s18 + $0x8] sm:$0xff] }
 0x309   : > { %v1460_v21 = vmul.f32 0.5, %v1452_v59  ;;  %v1470_v45 = vmul.f32 %v1462_v61, %v2561_v57 }
 0x30a   : > { %v1467_v6 = vmul.f32 %v1459_v0, %v2547_v28  ;;  %v1474_v28 = vld [vmem:[%s2657_s11 + $0x8] sm:$0xff] }
 0x30b   : > { %v1945_v35 = vpop.eup %1944  ;;  %v1468_v7 = vmul.f32 %v1460_v21, %v2551_v41  ;;  %v1484_v41 = vpop.permute.xlu2 %1483 }
 0x30c   : > { %v1947_v36 = vpop.eup %1946  ;;  %v1455_v54 = vadd.f32 1.0, %v1945_v35 }
 0x30d   : > { %v1456_v20 = vadd.f32 1.0, %v1947_v36 }
 0x30e   : > { %v1463_v15 = vmul.f32 0.5, %v1455_v54 }
 0x30f   : > { %v1464_v60 = vmul.f32 0.5, %v1456_v20 }
 0x310   : > { %v1471_v63 = vmul.f32 %v1463_v15, %v1370_v18  ;;  %v1465_v18 = vmul.f32 %v1457_v49, %v2541_v51  ;;  %v1475_v51 = vld [vmem:[%s2657_s11 + $0x10] sm:$0xff] }
 0x311   : > { %v1472_v1 = vmul.f32 %v1464_v60, %v1399_v23  ;;  %v1473_v23 = vld [vmem:[%s2657_s11] sm:$0xff]  ;;  %v1607_v60 = vld [vmem:[%s2607_s18 + $0x18] sm:$0xff] }
 0x312   : > { %1525 = vmatpush.msrb.mxu0 %v1471_v63 }
 0x313   : > { %1554 = vmatpush.msrb.mxu1 %v1472_v1  ;;  %v1494_v31 = vpop.permute.xlu2 %1493 }
 0x314   : > { %1526 = vmatpush.msrb.mxu0 %v1469_v53 }
 0x315   : > { %1555 = vmatpush.msrb.mxu1 %v1470_v45 }
 0x316   : > { %1527 = vmatpush.msrb.mxu0 %v1467_v6 }
 0x317   : > { %1556 = vmatpush.msrb.mxu1 %v1468_v7 }
 0x318   : > { %1528 = vmatpush.msrb.mxu0 %v1465_v18 }
 0x319   : > { %1557 = vmatpush.msrb.mxu1 %v1466_v55  ;;  %1792 = vmatmul.msk.f32.vlgmr.msrb.gmra.mxu0 %vm835_vm0, %v1473_v23 }
 0x31a   : > { %1796 = vmatmul.msk.f32.vlgmr.msrb.gmra.mxu1 %vm835_vm0, %v1473_v23 }
 0x321   : > { %1793 = vmatmul.msk.f32.gmra.mxu0 %vm835_vm0, %v1474_v28 }
 0x322   : > { %1797 = vmatmul.msk.f32.gmra.mxu1 %vm835_vm0, %v1474_v28 }
 0x329   : > { %1794 = vmatmul.msk.f32.gmra.mxu0 %vm835_vm0, %v1475_v51 }
 0x32a   : > { %1798 = vmatmul.msk.f32.gmra.mxu1 %vm835_vm0, %v1475_v51 }
 0x331   : > { %1795 = vmatmul.msk.f32.gmra.mxu0 %vm835_vm0, %v1476_v34 }
 0x332   : > { %1799 = vmatmul.msk.f32.gmra.mxu1 %vm835_vm0, %v1476_v34 }
 0x396   : > { %v1530_v57 = vpop.f32.mrf.mxu0 }
 0x397   : > { %v1531_v56 = vadd.f32 %v1530_v57, %v1484_v41  ;;  %v1559_v12 = vpop.f32.mrf.mxu1 }
 0x398   : > { %v1560_v17 = vadd.f32 %v1559_v12, %v1484_v41 }
 0x399   : > { %v1571_v48 = vadd.f32 %v1531_v56, %v2504_v58 }
 0x39a   : > { %v1572_v22 = vadd.f32 %v1560_v17, %v2511_v42 }
 0x39c   : > { %v1579_v62 = vadd.f32 %v1572_v22, %v1571_v48 }
 0x39e   : > { %1580 = vadd.xlane.f32.xlu1 %v1579_v62  ;;  %v1533_v4 = vpop.f32.mrf.mxu0 }
 0x39f   : > { %v1534_v10 = vadd.f32 %v1533_v4, %v1489_v27  ;;  %v1562_v47 = vpop.f32.mrf.mxu1 }
 0x3a0   : > { %v1563_v44 = vadd.f32 %v1562_v47, %v1489_v27 }
 0x3a1   : > { %v1573_v13 = vadd.f32 %v1534_v10, %v2496_v26 }
 0x3a2   : > { %v1574_v3 = vadd.f32 %v1563_v44, %v2500_v25 }
 0x3a4   : > { %v1582_v30 = vadd.f32 %v1574_v3, %v1573_v13 }
 0x3a6   : > { %1583 = vadd.xlane.f32.xlu2 %v1582_v30  ;;  %v1536_v58 = vpop.f32.mrf.mxu0 }
 0x3a7   : > { %v1537_v32 = vadd.f32 %v1536_v58, %v1494_v31  ;;  %v1565_v42 = vpop.f32.mrf.mxu1 }
 0x3a8   : > { %v1566_v33 = vadd.f32 %v1565_v42, %v1494_v31 }
 0x3a9   : > { %v1575_v37 = vadd.f32 %v1537_v32, %v2479_v11  ;;  %v1604_v11 = vld [vmem:[%s2607_s18] sm:$0xff] }
 0x3aa   : > { %v1576_v38 = vadd.f32 %v1566_v33, %v2489_v2 }
 0x3ac   : > { %v1585_v39 = vadd.f32 %v1576_v38, %v1575_v37 }
 0x3ae   : > { %1586 = vadd.xlane.f32.xlu0 %v1585_v39  ;;  %v1539_v26 = vpop.f32.mrf.mxu0 }
 0x3af   : > { %v1540_v24 = vadd.f32 %v1539_v26, %v1499_v40  ;;  %v1568_v25 = vpop.f32.mrf.mxu1 }
 0x3b0   : > { %v1569_v29 = vadd.f32 %v1568_v25, %v1499_v40 }
 0x3b1   : > { %v1577_v52 = vadd.f32 %v1540_v24, %v2472_v19  ;;  %v1606_v19 = vld [vmem:[%s2607_s18 + $0x10] sm:$0xff] }
 0x3b2   : > { %v1578_v35 = vadd.f32 %v1569_v29, %v2475_v9 }
 0x3b4   : > { %v1588_v14 = vadd.f32 %v1578_v35, %v1577_v52 }
 0x3b6   : > { %1589 = vadd.xlane.f32.xlu2 %v1588_v14 }
 0x411   : > { %v1581_v2 = vpop.xlane.xlu1 %1580 }
 0x412   : > { %v1591_v36 = vmul.f32 0.00390625, %v1581_v2 }
 0x414   : > { %v1608_v54 = vadd.f32 %v1604_v11, %v1591_v36 }
 0x416   : > { %1613 = vst.msk [vmem:[%s2607_s18] sm:$0xff] %vm1599_vm2, %v1608_v54 }
 0x419   : > { %v1584_v20 = vpop.xlane.xlu2 %1583 }
 0x41a   : > { %v1592_v59 = vmul.f32 0.00390625, %v1584_v20 }
 0x41c   : > { %v1609_v15 = vadd.f32 %v1605_v50, %v1592_v59 }
 0x41e   : > { %1614 = vst.msk [vmem:[%s2607_s18 + $0x8] sm:$0xff] %vm1599_vm2, %v1609_v15 }
 0x421   : > { %v1587_v43 = vpop.xlane.xlu0 %1586 }
 0x422   : > { %v1593_v9 = vmul.f32 0.00390625, %v1587_v43 }
 0x424   : > { %v1610_v8 = vadd.f32 %v1606_v19, %v1593_v9 }
 0x426   : > { %1615 = vst.msk [vmem:[%s2607_s18 + $0x10] sm:$0xff] %vm1599_vm2, %v1610_v8 }
 0x429   : > { %v1590_v61 = vpop.xlane.xlu2 %1589 }
 0x42a   : > { %v1594_v46 = vmul.f32 0.00390625, %v1590_v61 }
 0x42c   : > { %v1611_v63 = vadd.f32 %v1607_v60, %v1594_v46 }
 0x42e   : > { %1616 = vst.msk [vmem:[%s2607_s18 + $0x18] sm:$0xff] %vm1599_vm2, %v1611_v63 }
 0x42f PF: > { %s25_s15 = sadd.s32 1, %s1970_s15   ;;  %s2661_s29 = smov %s1966_s30 }
 0x430   : > { %p22_p5 = scmp.ge.s32.totalorder %s25_s15, 4   ;;  %s2662_s30 = smov %s2664_s16 }
 0x432   :  { %24 = sbr.rel (!%p22_p5) target bundleno = 2 (0x2), region = 118 }

</bundles_post_ra>
